<compile_context>
chip_gen: v7x
topology: tpu7x:2x2x1
jax: 0.10.0
libtpu: 0.0.40
codegen_flags: <defaults>
</compile_context>

<pallas_src>
import math
import functools

import jax
import jax.numpy as jnp
from jax.experimental import pallas as pl
from jax.experimental.pallas import tpu as pltpu


# ----------------------------------------------------------------------------
# Pallas kernel: fused (weight modulate+demodulate -> wide-K im2col matmul)
# ----------------------------------------------------------------------------
def _modconv_kernel(x_ref, w_ref, s_ref, d_ref, o_ref, wm_ref, *,
                    tile_h, Wo, Cin, ksize, tile_co, compute_dtype):
    """One (batch b, cout-tile co, h-tile h) grid step.   grid = (B, n_co, n_h).

    x_ref : (1, Hp, Wp, Cin)      padded NHWC image of batch b (compute_dtype),
                                  VMEM-resident across the co / h grid axes.
    w_ref : (k*k, Cin, tile_co)   base conv weight, EqualConv scale folded in.
    s_ref : (1, 1, Cin)           per-input-channel style modulation   (f32).
    d_ref : (1, 1, tile_co)       per-output-channel demodulation      (f32).
    o_ref : (1, tile_h, Wo, tile_co)
    wm_ref: (k*k*Cin, tile_co)    VMEM scratch: modulated+demodulated weight tile.
    """
    h = pl.program_id(2)

    # Modulated (and demodulated) weight tile.  Depends only on (b, co): build it
    # once at h == 0 and reuse it across all h steps of this (b, co) from scratch.
    @pl.when(h == 0)
    def _():
        wf = w_ref[...].astype(jnp.float32)                              # (k*k, Cin, tn)
        wf = wf * s_ref[0, 0, :].astype(jnp.float32)[None, :, None]
        wf = wf * d_ref[0, 0, :].astype(jnp.float32)[None, None, :]
        wm_ref[...] = wf.reshape(ksize * ksize * Cin, tile_co).astype(compute_dtype)

    # Fused im2col: gather the k*k shifted (tile_h, Wo, Cin) windows of the
    # VMEM-resident padded image (no modulation / no cast on the activation side)
    # and concatenate along channels -> ONE wide-K matmul per step (single MXU
    # drain, single accumulator/output write).
    row0 = h * tile_h
    cols = []
    for dy in range(ksize):
        for dx in range(ksize):
            cols.append(x_ref[0, pl.ds(row0 + dy, tile_h), dx:dx + Wo, :])
    patches = jnp.concatenate(cols, axis=-1)                             # (th, Wo, k*k*Cin)
    patches = patches.reshape(tile_h * Wo, ksize * ksize * Cin)

    acc = jnp.dot(patches, wm_ref[...], preferred_element_type=jnp.float32)
    o_ref[...] = acc.reshape(1, tile_h, Wo, tile_co).astype(o_ref.dtype)


# ----------------------------------------------------------------------------
# Glue (plain JAX): EqualLinear modulation, demod precompute, packing, tiling.
# ----------------------------------------------------------------------------
def _round_up(x, m):
    return (x + m - 1) // m * m


def equal_linear(x, weight, bias, lr_mul=1.0):
    """EqualLinear, no activation: x @ (W*scale).T + bias*lr_mul (tiny; JAX glue)."""
    scale = (1.0 / math.sqrt(weight.shape[1])) * lr_mul
    return x @ (weight * scale).T + bias * lr_mul


def modulated_conv2d(x_nchw, style, params, *, demodulate=True,
                     compute_dtype=jnp.bfloat16, tile_co=None, target_rows=1024):
    """ModulatedConv2d forward (default path, no up/down-sampling). NCHW in/out."""
    B, Cin, H, W = x_nchw.shape
    weight = params["weight"][0]                          # (Cout, Cin, k, k)
    Cout, _, k, _ = weight.shape
    pad = k // 2
    scale = 1.0 / math.sqrt(Cin * k * k)

    # Style modulation (EqualLinear) — tiny, kept as JAX glue.
    s = equal_linear(style, params["w_mod"], params["b_mod"]).astype(jnp.float32)   # (B, Cin)

    # Demodulation factors, precomputed in f32 from the full-precision modulated
    # weights (matches PyTorch exactly; removes all per-step reductions in the kernel).
    w_scaled = (weight * scale).astype(jnp.float32)       # (Cout, Cin, k, k)
    if demodulate:
        w_sq = jnp.sum(w_scaled * w_scaled, axis=(2, 3))                  # (Cout, Cin)
        demod = jax.lax.rsqrt((s * s) @ w_sq.T + 1e-8)                    # (B, Cout)
    else:
        demod = jnp.ones((B, Cout), jnp.float32)

    # Output-channel tiling: lane-dense stores.  Use 256-wide tiles when Cout pads to
    # a multiple of 256 (fills the v6e/v7x 256-wide MXU; harmless on v5e), else 128.
    if tile_co is None:
        c128 = _round_up(Cout, 128)
        tile_co = 256 if c128 % 256 == 0 else 128
    Cout_pad = _round_up(Cout, tile_co)
    n_co = Cout_pad // tile_co

    # Pack weights: (k*k, Cin, Cout_pad), conv scale folded in.
    w_pack = jnp.transpose(w_scaled, (2, 3, 1, 0)).reshape(k * k, Cin, Cout)
    w_pack = jnp.pad(w_pack, ((0, 0), (0, 0), (0, Cout_pad - Cout))).astype(compute_dtype)
    demod_pad = jnp.pad(demod, ((0, 0), (0, Cout_pad - Cout)), constant_values=1.0)
    demod_pad = demod_pad.reshape(B, 1, Cout_pad)
    s3 = s.reshape(B, 1, Cin)

    # H tiling: cdiv grid (+ zero-padded rows) targeting ~target_rows matmul rows/step.
    Ho, Wo = H, W
    tile_h = max(1, min(Ho, max(1, target_rows // Wo)))
    n_h = -(-Ho // tile_h)
    tile_h = -(-Ho // n_h)
    Ho_pad = n_h * tile_h

    # NHWC + compute-dtype cast fused into the spatial zero-padding (single glue pass).
    x = jnp.transpose(x_nchw, (0, 2, 3, 1)).astype(compute_dtype)
    xp = jnp.pad(x, ((0, 0), (pad, pad + (Ho_pad - Ho)), (pad, pad), (0, 0)))
    Hp, Wp = Ho_pad + 2 * pad, W + 2 * pad

    # VMEM budget from actual buffer arithmetic (default BlockSpec double-buffering),
    # capped against the physical VMEM when the runtime exposes it.
    cd_b = jnp.dtype(compute_dtype).itemsize
    out_b = jnp.dtype(x_nchw.dtype).itemsize
    need = 2 * Hp * Wp * Cin * cd_b                      # resident padded image
    need += 2 * k * k * Cin * tile_co * cd_b             # weight tile
    need += 2 * tile_h * Wo * tile_co * out_b            # output tile
    need += k * k * Cin * tile_co * cd_b                 # wm scratch
    need += tile_h * Wo * k * k * Cin * cd_b             # im2col patches working set
    need += tile_h * Wo * tile_co * 4                    # f32 matmul result
    need += 2 * (Cin + tile_co) * 4                      # s / demod blocks
    try:
        phys = int(pltpu.get_tpu_info().vmem_capacity_bytes)
    except Exception:
        phys = 64 * 1024 * 1024                          # conservative (v7x per-TC)
    vmem_limit = min(max(int(need) + (8 << 20), 32 << 20), int(phys * 0.85))

    kernel = functools.partial(
        _modconv_kernel, tile_h=tile_h, Wo=Wo, Cin=Cin, ksize=k,
        tile_co=tile_co, compute_dtype=compute_dtype)

    # The padded image of one batch element is held resident in VMEM (its block index
    # only depends on b), so HBM reads it exactly once per image.
    out = pl.pallas_call(
        kernel,
        out_shape=jax.ShapeDtypeStruct((B, Ho_pad, Wo, Cout_pad), x_nchw.dtype),
        grid=(B, n_co, n_h),
        in_specs=[
            pl.BlockSpec((1, Hp, Wp, Cin), lambda b, co, h: (b, 0, 0, 0)),
            pl.BlockSpec((k * k, Cin, tile_co), lambda b, co, h: (0, 0, co)),
            pl.BlockSpec((1, 1, Cin), lambda b, co, h: (b, 0, 0)),
            pl.BlockSpec((1, 1, tile_co), lambda b, co, h: (b, 0, co)),
        ],
        out_specs=pl.BlockSpec((1, tile_h, Wo, tile_co),
                               lambda b, co, h: (b, h, 0, co)),
        scratch_shapes=[pltpu.VMEM((k * k * Cin, tile_co), compute_dtype)],
        compiler_params=pltpu.CompilerParams(
            dimension_semantics=("parallel", "parallel", "arbitrary"),
            vmem_limit_bytes=vmem_limit),
    )(xp, w_pack, s3, demod_pad)

    # NOTE: if the consumer can take NHWC / channel-padded output, these two glue
    # passes (slice + transpose) can be dropped for a direct HBM-bandwidth win.
    out = out[:, :Ho, :, :Cout]
    return jnp.transpose(out, (0, 3, 1, 2))               # NHWC -> NCHW


def init_modulated_conv2d_params(key, Cin, Cout, ksize, style_dim):
    kw, km = jax.random.split(key)
    return dict(
        weight=jax.random.normal(kw, (1, Cout, Cin, ksize, ksize), jnp.float32),
        w_mod=jax.random.normal(km, (Cin, style_dim), jnp.float32),   # EqualLinear W
        b_mod=jnp.ones((Cin,), jnp.float32),                          # bias_init = 1
    )


# ----------------------------------------------------------------------------
# Pure-JAX reference (mirrors the PyTorch forward exactly; correctness only).
# ----------------------------------------------------------------------------
def modulated_conv2d_reference(x_nchw, style, params, demodulate=True):
    B, Cin, H, W = x_nchw.shape
    w = params["weight"]                                  # (1, Cout, Cin, k, k)
    Cout, k = w.shape[1], w.shape[3]
    scale = 1.0 / math.sqrt(Cin * k * k)
    s = equal_linear(style, params["w_mod"], params["b_mod"])          # (B, Cin)
    weight = scale * w * s[:, None, :, None, None]                     # (B,Cout,Cin,k,k)
    if demodulate:
        demod = jax.lax.rsqrt(jnp.sum(weight ** 2, axis=(2, 3, 4)) + 1e-8)
        weight = weight * demod[:, :, None, None, None]
    pad = k // 2
    outs = [jax.lax.conv_general_dilated(
                x_nchw[b:b + 1], weight[b], (1, 1), ((pad, pad), (pad, pad)),
                dimension_numbers=("NCHW", "OIHW", "NCHW"))
            for b in range(B)]
    return jnp.concatenate(outs, axis=0)


if __name__ == "__main__":
    key = jax.random.PRNGKey(0)
    kx, ks, kp, kx2, ks2, kp2 = jax.random.split(key, 6)

    # --- small shapes -------------------------------------------------------
    B, Cin, Cout, H, W, style_dim = 2, 4, 8, 16, 16, 32
    x = jax.random.normal(kx, (B, Cin, H, W), jnp.float32)
    style = jax.random.normal(ks, (B, style_dim), jnp.float32)
    params = init_modulated_conv2d_params(kp, Cin, Cout, 3, style_dim)

    y_ref = modulated_conv2d_reference(x, style, params)

    y_f32 = jax.block_until_ready(
        modulated_conv2d(x, style, params, compute_dtype=jnp.float32))
    assert y_f32.shape == (B, Cout, H, W), y_f32.shape
    err_f32 = float(jnp.max(jnp.abs(y_f32 - y_ref)))
    assert err_f32 < 1e-3, f"f32 mismatch vs reference: {err_f32}"

    y_bf16 = jax.block_until_ready(
        modulated_conv2d(x, style, params, compute_dtype=jnp.bfloat16))
    assert y_bf16.shape == (B, Cout, H, W), y_bf16.shape
    err_bf16 = float(jnp.max(jnp.abs(y_bf16 - y_ref)))
    assert err_bf16 < 2e-1, f"bf16 mismatch vs reference: {err_bf16}"

    # --- second shape: exercises Cout lane padding, non-divisor H (cdiv grid +
    #     row padding), Cin not a multiple of 128, wider matmul K. ------------
    B2, Cin2, Cout2, H2, W2 = 1, 32, 48, 17, 128
    x2 = jax.random.normal(kx2, (B2, Cin2, H2, W2), jnp.float32)
    style2 = jax.random.normal(ks2, (B2, style_dim), jnp.float32)
    params2 = init_modulated_conv2d_params(kp2, Cin2, Cout2, 3, style_dim)

    y2_ref = modulated_conv2d_reference(x2, style2, params2)
    y2_f32 = jax.block_until_ready(
        modulated_conv2d(x2, style2, params2, compute_dtype=jnp.float32))
    assert y2_f32.shape == (B2, Cout2, H2, W2), y2_f32.shape
    err2_f32 = float(jnp.max(jnp.abs(y2_f32 - y2_ref)))
    assert err2_f32 < 1e-3, f"f32 mismatch (shape 2) vs reference: {err2_f32}"

    y2_bf16 = jax.block_until_ready(
        modulated_conv2d(x2, style2, params2, compute_dtype=jnp.bfloat16))
    err2_bf16 = float(jnp.max(jnp.abs(y2_bf16 - y2_ref)))
    assert err2_bf16 < 3e-1, f"bf16 mismatch (shape 2) vs reference: {err2_bf16}"

    print("KERNEL_OK")
</pallas_src>

<mosaic_0001>
module attributes {stable_mosaic.version = 11 : i64} {
  func.func @_modconv_kernel(%arg0: i32, %arg1: i32, %arg2: i32, %arg3: memref<1x18x18x4xf32, #tpu.memory_space<vmem>>, %arg4: memref<9x4x128xf32, #tpu.memory_space<vmem>>, %arg5: memref<1x1x4xf32, #tpu.memory_space<vmem>>, %arg6: memref<1x1x128xf32, #tpu.memory_space<vmem>>, %arg7: memref<1x16x16x128xf32, #tpu.memory_space<vmem>>, %arg8: memref<36x128xf32, #tpu.memory_space<vmem>>) attributes {dimension_semantics = [#tpu.dimension_semantics<parallel>, #tpu.dimension_semantics<parallel>, #tpu.dimension_semantics<arbitrary>], iteration_bounds = array<i64: 2, 1, 1>, scalar_prefetch = 0 : i64, scratch_operands = 1 : i64, tpu.core_type = #tpu.core_type<tc>, window_params = [{transform_indices = @transform_0, window_bounds = array<i64: 1, 18, 18, 4>}, {transform_indices = @transform_1, window_bounds = array<i64: 9, 4, 128>}, {transform_indices = @transform_2, window_bounds = array<i64: 1, 1, 4>}, {transform_indices = @transform_3, window_bounds = array<i64: 1, 1, 128>}, {transform_indices = @transform_4, window_bounds = array<i64: 1, 16, 16, 128>}]} {
    %c0_i32 = arith.constant 0 : i32
    %0 = arith.cmpi eq, %arg2, %c0_i32 : i32
    %1 = arith.extui %0 : i1 to i32
    %c0_i32_0 = arith.constant 0 : i32
    %2 = arith.cmpi ne, %1, %c0_i32_0 : i32
    scf.if %2 {
      %c0_38 = arith.constant 0 : index
      %c0_39 = arith.constant 0 : index
      %c0_40 = arith.constant 0 : index
      %46 = vector.load %arg4[%c0_38, %c0_39, %c0_40] : memref<9x4x128xf32, #tpu.memory_space<vmem>>, vector<9x4x128xf32>
      %c0_41 = arith.constant 0 : index
      %c0_42 = arith.constant 0 : index
      %c0_43 = arith.constant 0 : index
      %47 = vector.load %arg5[%c0_41, %c0_42, %c0_43] : memref<1x1x4xf32, #tpu.memory_space<vmem>>, vector<1x1x4xf32>
      %48 = vector.shape_cast %47 : vector<1x1x4xf32> to vector<4xf32>
      %49 = vector.shape_cast %48 : vector<4xf32> to vector<1x4x1xf32>
      %50 = vector.broadcast %49 : vector<1x4x1xf32> to vector<9x4x128xf32>
      %51 = arith.mulf %46, %50 : vector<9x4x128xf32>
      %c0_44 = arith.constant 0 : index
      %c0_45 = arith.constant 0 : index
      %c0_46 = arith.constant 0 : index
      %52 = vector.load %arg6[%c0_44, %c0_45, %c0_46] : memref<1x1x128xf32, #tpu.memory_space<vmem>>, vector<1x1x128xf32>
      %53 = vector.shape_cast %52 : vector<1x1x128xf32> to vector<128xf32>
      %54 = vector.shape_cast %53 : vector<128xf32> to vector<1x1x128xf32>
      %55 = vector.broadcast %54 : vector<1x1x128xf32> to vector<9x4x128xf32>
      %56 = arith.mulf %51, %55 : vector<9x4x128xf32>
      %57 = vector.shape_cast %56 : vector<9x4x128xf32> to vector<36x128xf32>
      %c0_47 = arith.constant 0 : index
      %c0_48 = arith.constant 0 : index
      %58 = vector.load %arg8[%c0_47, %c0_48] : memref<36x128xf32, #tpu.memory_space<vmem>>, vector<36x128xf32>
      tpu.vector_store %arg8[%c0_47, %c0_48], %57 {strides = array<i32>} : memref<36x128xf32, #tpu.memory_space<vmem>>, vector<36x128xf32>,
    } else {
    }
    %c16_i32 = arith.constant 16 : i32
    %3 = arith.muli %arg2, %c16_i32 : i32
    %c0_i32_1 = arith.constant 0 : i32
    %4 = arith.addi %3, %c0_i32_1 : i32
    %c0 = arith.constant 0 : index
    %5 = arith.index_cast %4 : i32 to index
    %c0_2 = arith.constant 0 : index
    %c0_3 = arith.constant 0 : index
    %6 = vector.load %arg3[%c0, %5, %c0_2, %c0_3] : memref<1x18x18x4xf32, #tpu.memory_space<vmem>>, vector<1x16x16x4xf32>
    %7 = vector.shape_cast %6 : vector<1x16x16x4xf32> to vector<16x16x4xf32>
    %c0_i32_4 = arith.constant 0 : i32
    %8 = arith.addi %3, %c0_i32_4 : i32
    %c0_5 = arith.constant 0 : index
    %9 = arith.index_cast %8 : i32 to index
    %c1 = arith.constant 1 : index
    %c0_6 = arith.constant 0 : index
    %10 = vector.load %arg3[%c0_5, %9, %c1, %c0_6] : memref<1x18x18x4xf32, #tpu.memory_space<vmem>>, vector<1x16x16x4xf32>
    %11 = vector.shape_cast %10 : vector<1x16x16x4xf32> to vector<16x16x4xf32>
    %c0_i32_7 = arith.constant 0 : i32
    %12 = arith.addi %3, %c0_i32_7 : i32
    %c0_8 = arith.constant 0 : index
    %13 = arith.index_cast %12 : i32 to index
    %c2 = arith.constant 2 : index
    %c0_9 = arith.constant 0 : index
    %14 = vector.load %arg3[%c0_8, %13, %c2, %c0_9] : memref<1x18x18x4xf32, #tpu.memory_space<vmem>>, vector<1x16x16x4xf32>
    %15 = vector.shape_cast %14 : vector<1x16x16x4xf32> to vector<16x16x4xf32>
    %c1_i32 = arith.constant 1 : i32
    %16 = arith.addi %3, %c1_i32 : i32
    %c0_10 = arith.constant 0 : index
    %17 = arith.index_cast %16 : i32 to index
    %c0_11 = arith.constant 0 : index
    %c0_12 = arith.constant 0 : index
    %18 = vector.load %arg3[%c0_10, %17, %c0_11, %c0_12] : memref<1x18x18x4xf32, #tpu.memory_space<vmem>>, vector<1x16x16x4xf32>
    %19 = vector.shape_cast %18 : vector<1x16x16x4xf32> to vector<16x16x4xf32>
    %c1_i32_13 = arith.constant 1 : i32
    %20 = arith.addi %3, %c1_i32_13 : i32
    %c0_14 = arith.constant 0 : index
    %21 = arith.index_cast %20 : i32 to index
    %c1_15 = arith.constant 1 : index
    %c0_16 = arith.constant 0 : index
    %22 = vector.load %arg3[%c0_14, %21, %c1_15, %c0_16] : memref<1x18x18x4xf32, #tpu.memory_space<vmem>>, vector<1x16x16x4xf32>
    %23 = vector.shape_cast %22 : vector<1x16x16x4xf32> to vector<16x16x4xf32>
    %c1_i32_17 = arith.constant 1 : i32
    %24 = arith.addi %3, %c1_i32_17 : i32
    %c0_18 = arith.constant 0 : index
    %25 = arith.index_cast %24 : i32 to index
    %c2_19 = arith.constant 2 : index
    %c0_20 = arith.constant 0 : index
    %26 = vector.load %arg3[%c0_18, %25, %c2_19, %c0_20] : memref<1x18x18x4xf32, #tpu.memory_space<vmem>>, vector<1x16x16x4xf32>
    %27 = vector.shape_cast %26 : vector<1x16x16x4xf32> to vector<16x16x4xf32>
    %c2_i32 = arith.constant 2 : i32
    %28 = arith.addi %3, %c2_i32 : i32
    %c0_21 = arith.constant 0 : index
    %29 = arith.index_cast %28 : i32 to index
    %c0_22 = arith.constant 0 : index
    %c0_23 = arith.constant 0 : index
    %30 = vector.load %arg3[%c0_21, %29, %c0_22, %c0_23] : memref<1x18x18x4xf32, #tpu.memory_space<vmem>>, vector<1x16x16x4xf32>
    %31 = vector.shape_cast %30 : vector<1x16x16x4xf32> to vector<16x16x4xf32>
    %c2_i32_24 = arith.constant 2 : i32
    %32 = arith.addi %3, %c2_i32_24 : i32
    %c0_25 = arith.constant 0 : index
    %33 = arith.index_cast %32 : i32 to index
    %c1_26 = arith.constant 1 : index
    %c0_27 = arith.constant 0 : index
    %34 = vector.load %arg3[%c0_25, %33, %c1_26, %c0_27] : memref<1x18x18x4xf32, #tpu.memory_space<vmem>>, vector<1x16x16x4xf32>
    %35 = vector.shape_cast %34 : vector<1x16x16x4xf32> to vector<16x16x4xf32>
    %c2_i32_28 = arith.constant 2 : i32
    %36 = arith.addi %3, %c2_i32_28 : i32
    %c0_29 = arith.constant 0 : index
    %37 = arith.index_cast %36 : i32 to index
    %c2_30 = arith.constant 2 : index
    %c0_31 = arith.constant 0 : index
    %38 = vector.load %arg3[%c0_29, %37, %c2_30, %c0_31] : memref<1x18x18x4xf32, #tpu.memory_space<vmem>>, vector<1x16x16x4xf32>
    %39 = vector.shape_cast %38 : vector<1x16x16x4xf32> to vector<16x16x4xf32>
    %40 = tpu.concatenate %7, %11, %15, %19, %23, %27, %31, %35, %39 in 2 : vector<16x16x4xf32>, vector<16x16x4xf32>, vector<16x16x4xf32>, vector<16x16x4xf32>, vector<16x16x4xf32>, vector<16x16x4xf32>, vector<16x16x4xf32>, vector<16x16x4xf32>, vector<16x16x4xf32> -> vector<16x16x36xf32>
    %41 = vector.shape_cast %40 : vector<16x16x36xf32> to vector<256x36xf32>
    %c0_32 = arith.constant 0 : index
    %c0_33 = arith.constant 0 : index
    %42 = vector.load %arg8[%c0_32, %c0_33] : memref<36x128xf32, #tpu.memory_space<vmem>>, vector<36x128xf32>
    %cst = arith.constant dense<0.000000e+00> : vector<256x128xf32>
    %43 = tpu.matmul %41, %42, %cst {dimension_numbers = #tpu.dot_dimension_numbers<[1], [0], [0], [1], [0, 0, 1, 1], [], []>} : vector<256x36xf32>, vector<36x128xf32>, vector<256x128xf32> -> vector<256x128xf32>
    %44 = vector.shape_cast %43 : vector<256x128xf32> to vector<1x16x16x128xf32>
    %c0_34 = arith.constant 0 : index
    %c0_35 = arith.constant 0 : index
    %c0_36 = arith.constant 0 : index
    %c0_37 = arith.constant 0 : index
    %45 = vector.load %arg7[%c0_34, %c0_35, %c0_36, %c0_37] : memref<1x16x16x128xf32, #tpu.memory_space<vmem>>, vector<1x16x16x128xf32>
    tpu.vector_store %arg7[%c0_34, %c0_35, %c0_36, %c0_37], %44 {strides = array<i32>} : memref<1x16x16x128xf32, #tpu.memory_space<vmem>>, vector<1x16x16x128xf32>,
    return
  }
  func.func @transform_0(%arg0: i32, %arg1: i32, %arg2: i32) -> (i32, i32, i32, i32) {
    %c0_i32 = arith.constant 0 : i32
    %c0_i32_0 = arith.constant 0 : i32
    %c0_i32_1 = arith.constant 0 : i32
    %c0_i32_2 = arith.constant 0 : i32
    return %arg0, %c0_i32, %c0_i32_0, %c0_i32_1 : i32, i32, i32, i32
  }
  func.func @transform_1(%arg0: i32, %arg1: i32, %arg2: i32) -> (i32, i32, i32) {
    %c0_i32 = arith.constant 0 : i32
    %c0_i32_0 = arith.constant 0 : i32
    %c0_i32_1 = arith.constant 0 : i32
    return %c0_i32, %c0_i32_0, %arg1 : i32, i32, i32
  }
  func.func @transform_2(%arg0: i32, %arg1: i32, %arg2: i32) -> (i32, i32, i32) {
    %c0_i32 = arith.constant 0 : i32
    %c0_i32_0 = arith.constant 0 : i32
    %c0_i32_1 = arith.constant 0 : i32
    return %arg0, %c0_i32, %c0_i32_0 : i32, i32, i32
  }
  func.func @transform_3(%arg0: i32, %arg1: i32, %arg2: i32) -> (i32, i32, i32) {
    %c0_i32 = arith.constant 0 : i32
    %c0_i32_0 = arith.constant 0 : i32
    return %arg0, %c0_i32, %arg1 : i32, i32, i32
  }
  func.func @transform_4(%arg0: i32, %arg1: i32, %arg2: i32) -> (i32, i32, i32, i32) {
    %c0_i32 = arith.constant 0 : i32
    %c0_i32_0 = arith.constant 0 : i32
    return %arg0, %arg2, %c0_i32, %arg1 : i32, i32, i32, i32
  }
}

</mosaic_0001>

<bundles_post_ra>
// kernel: tpu_custom_call.1
= control target key start
LH: loop header
LB: loop body
LE: loop exit
PB: predicated region body
PF: predicated region fallthrough
CT: control target
= control target key end

     0   :  { %9 = vsyncpa [#allocation4], 0  ;;  %s4482_s0 = inlined_call_operand.vmem [shape: f32[2,18,18,4], index: 0, kind: input, shape index: {}]   ;;  %s4483_s1 = inlined_call_operand.vmem [shape: f32[9,4,128], index: 1, kind: input, shape index: {}]   ;;  %s4484_s2 = inlined_call_operand.vmem [shape: f32[2,1,4], index: 2, kind: input, shape index: {}]   ;;  %s4485_s3 = inlined_call_operand.vmem [shape: f32[2,1,128], index: 3, kind: input, shape index: {}]   ;;  %s4486_s4 = inlined_call_operand.hbm [shape: f32[2,16,16,128], index: 4, kind: output, shape index: {}]  }
   0x1   :  { %11 = vsyncpa [#allocation4 + $0x1], 0  ;;  %s2962_s15 = smov 0   ;;  %s2964_s16 = smov 0  }
   0x2   :  { %s2966_s17 = smov 0   ;;  %s2968_s18 = smov 0  }
   0x3   :  { %s2970_s19 = smov 0   ;;  %s2972_s20 = smov 0  }
   0x4 LB: > { %s2432_s21 = sadd.s32 4294967295, %s2925_s20   ;;  %s2433_s22 = sadd.s32 4294967294, %s2925_s20   ;;  %s2925_s20 = sphi %s2972_s20, %s17_s20   ;;  %s2921_s19 = sphi %s2970_s19, %s4625_s19   ;;  %s2917_s18 = sphi %s2968_s18, %s4624_s18   ;;  %s2913_s17 = sphi %s2966_s17, %s4623_s17   ;;  %s2909_s16 = sphi %s2964_s16, %s4622_s16   ;;  %s2905_s15 = sphi %s2962_s15, %s4621_s15  }
   0x5   : > { %s36_s23 = sadd.s32 1, %s2921_s19  ;;  %s153_s24 = sadd.s32 1, %s2913_s17 }
   0x6   : > { %p38_p0 = scmp.ge.s32.totalorder %s36_s23, 2  ;;  %p163_p1 = scmp.ne.s32.totalorder %s2913_s17, %s2909_s16 }
   0x7   : > { %p164_p2 = scmp.eq.s32.totalorder %s2432_s21, 1  ;;  %p169_p3 = scmp.ne.s32.totalorder %s2909_s16, %s2905_s15 }
   0x8   : > { %s4627_s23 = smov (%p38_p0, %s36_s23), 0  ;;  %p170_p5 = scmp.eq.s32.totalorder %s2433_s22, 1 }
   0x9   : > { %p3002_p4 = por %p164_p2, %p163_p1  ;;  %s146_s26 = ssub.s32 %s2921_s19, %s4627_s23 }
   0xa   : > { %p2437_p6 = scmp.ge.s32.totalorder %s2925_s20, 1  ;;  %p151_p7 = scmp.eq.s32.totalorder %s146_s26, 0 }
   0xb   : > { %p3009_p8 = por %p170_p5, %p169_p3  ;;  %p218_p9 = scmp.lt.s32.totalorder %s2925_s20, 3 }
   0xc   : > { %s3015_s28 = scalar_select %p151_p7, %s2913_s17, %s153_s24  }
   0xd   : > { %p219_p10 = pnand %p2437_p6, %p218_p9 }
   0xf   : > { %222 = sbr.rel (%p219_p10) target bundleno = 884 (0x374), region = 36 }
  0x16   : > { %p257_p11 = scmp.lt.s32.totalorder %s2917_s18, 1  ;;  %s2927_s11 = smov 4   ;;  %v280_v57 = vld [vmem:[%s4483_s1] sm:$0xf]  ;;  %v281_v58 = vld [vmem:[%s4483_s1 + $0x4] sm:$0xf] }
  0x17   : > { %s2928_s12 = smov 8   ;;  %v282_v59 = vld [vmem:[%s4483_s1 + $0x8] sm:$0xf]  ;;  %v283_v60 = vld [vmem:[%s4483_s1 + $0xc] sm:$0xf]  ;;  %vm2030_vm0 = vcmask 1043456  }
  0x18   : > { %s3019_s29 = scalar_select %p257_p11, %s2917_s18, 1  ;;  %v284_v61 = vld [vmem:[%s4483_s1 + $0x10] sm:$0xf]  ;;  %v285_v62 = vld [vmem:[%s4483_s1 + $0x14] sm:$0xf]  ;;  %vm1664_vm1 = vcmask 31744  }
  0x19   : > { %vm1697_vm2 = vcmask 64512   ;;  %s2932_s8 = smov 24   ;;  %s2933_s9 = smov 28   ;;  %vm1730_vm3 = vcmask 97280   ;;  %vm1763_vm4 = vcmask 130048   ;;  %vm1796_vm5 = vcmask 162816  }
  0x1a   : > { %s268_s6 = scalar_lea.vmem %s4484_s2, %s3019_s29  ;;  %s2782_s7 = smul.u32 432, %s3019_s29  ;;  %vm1829_vm6 = vcmask 195584   ;;  %vm1862_vm7 = vcmask 228352   ;;  %vm1895_vm8 = vcmask 261120   ;;  %vm1933_vm9 = vcmask 293888  }
  0x1b   : > { %v2440_v0 = vld [vmem:[%s268_s6] ss:$0 sm:$0xff]  ;;  %s274_s24 = scalar_lea.vmem %s4485_s3, %s3019_s29  ;;  %s2930_s6 = smov 16  }
  0x1c   : > { %295 = vbcast.lane.b32.xlu0 %v2440_v0, 256  ;;  %s3029_s10 = scalar_lea.vmem %s4482_s0, %s2782_s7  ;;  %v286_v0 = vld [vmem:[%s4483_s1 + $0x18] sm:$0xf]  ;;  %s2931_s7 = smov 20  }
  0x1d   : > { %v379_v1 = vld [vmem:[%s3029_s10 + $0x9] sm:$0xff]  ;;  %v378_v2 = vld [vmem:[%s3029_s10 + $0x1] sm:$0xff]  ;;  %v3036_v3 = vld [vmem:[%s3029_s10 + $0x19] sm:$0xff]  ;;  %s2934_s29 = smov 32   ;;  %s2672_s14 = sshll.u32 %s2917_s18, 12 }
  0x1e   : > { %674 = vrot.lane.b32.xlu1 %v379_v1, %s2927_s11  ;;  %v3039_v4 = vld [vmem:[%s3029_s10 + $0x21] sm:$0xff]  ;;  %v3046_v5 = vld [vmem:[%s3029_s10 + $0x31] sm:$0xff]  ;;  %v3049_v6 = vld [vmem:[%s3029_s10 + $0x39] sm:$0xff]  ;;  %s4425_s30 = scalar_lea.hbm %s4486_s4, %s2672_s14 }
  0x1f   : > { %v3056_v7 = vld [vmem:[%s3029_s10 + $0x49] sm:$0xff]  ;;  %v3059_v8 = vld [vmem:[%s3029_s10 + $0x51] sm:$0xff]  ;;  %v3066_v9 = vld [vmem:[%s3029_s10 + $0x61] sm:$0xff] }
  0x20   : > { %672 = vrot.lane.b32.xlu0 %v378_v2, %s2927_s11  ;;  %v387_v10 = vld [vmem:[%s3029_s10 + $0x69] sm:$0xff]  ;;  %v388_v11 = vld [vmem:[%s3029_s10 + $0x79] sm:$0xff]  ;;  %v389_v12 = vld [vmem:[%s3029_s10 + $0x81] sm:$0xff] }
  0x21   : > { %v390_v13 = vld [vmem:[%s3029_s10 + $0x91] sm:$0xff]  ;;  %v391_v14 = vld [vmem:[%s3029_s10 + $0x99] sm:$0xff]  ;;  %v392_v15 = vld [vmem:[%s3029_s10 + $0xa9] sm:$0xff] }
  0x22   : > { %676 = vrot.lane.b32.xlu1 %v3036_v3, %s2927_s11  ;;  %v393_v16 = vld [vmem:[%s3029_s10 + $0xb1] sm:$0xff]  ;;  %v394_v17 = vld [vmem:[%s3029_s10 + $0xc1] sm:$0xff]  ;;  %v395_v18 = vld [vmem:[%s3029_s10 + $0xc9] sm:$0xff] }
  0x23   : > { %v3089_v19 = vld [vmem:[%s3029_s10 + $0xd9] sm:$0xff]  ;;  %v3092_v20 = vld [vmem:[%s3029_s10 + $0xe1] sm:$0xff]  ;;  %v3099_v21 = vld [vmem:[%s3029_s10 + $0xf1] sm:$0xff] }
  0x24   : > { %678 = vrot.lane.b32.xlu0 %v3039_v4, %s2927_s11  ;;  %v3102_v22 = vld [vmem:[%s3029_s10 + $0xf9] sm:$0xff]  ;;  %v3109_v23 = vld [vmem:[%s3029_s10 + $0x109] sm:$0xff]  ;;  %v3112_v24 = vld [vmem:[%s3029_s10 + $0x111] sm:$0xff] }
  0x25   : > { %4525 = vst [vmem:[#allocation6_spill] sm:$0xff] %v3109_v23  ;;  %4526 = vst [vmem:[#allocation7_spill] sm:$0xff] %v3112_v24  ;;  %v402_v25 = vld [vmem:[%s3029_s10 + $0x121] sm:$0xff]  ;;  %v403_v26 = vld [vmem:[%s3029_s10 + $0x129] sm:$0xff] }
  0x26   : > { %680 = vrot.lane.b32.xlu1 %v3046_v5, %s2927_s11  ;;  %v404_v27 = vld [vmem:[%s3029_s10 + $0x139] sm:$0xff]  ;;  %v405_v28 = vld [vmem:[%s3029_s10 + $0x141] sm:$0xff]  ;;  %v406_v29 = vld [vmem:[%s3029_s10 + $0x151] sm:$0xff] }
  0x27   : > { %v407_v30 = vld [vmem:[%s3029_s10 + $0x159] sm:$0xff]  ;;  %v408_v31 = vld [vmem:[%s3029_s10 + $0x169] sm:$0xff]  ;;  %v409_v32 = vld [vmem:[%s3029_s10 + $0x171] sm:$0xff] }
  0x28   : > { %682 = vrot.lane.b32.xlu0 %v3049_v6, %s2927_s11  ;;  %v410_v33 = vld [vmem:[%s3029_s10 + $0x2] sm:$0xff]  ;;  %v411_v34 = vld [vmem:[%s3029_s10 + $0xa] sm:$0xff]  ;;  %v3139_v35 = vld [vmem:[%s3029_s10 + $0x1a] sm:$0xff] }
  0x29   : > { %v3142_v36 = vld [vmem:[%s3029_s10 + $0x22] sm:$0xff]  ;;  %v3149_v37 = vld [vmem:[%s3029_s10 + $0x32] sm:$0xff]  ;;  %v3152_v38 = vld [vmem:[%s3029_s10 + $0x3a] sm:$0xff] }
  0x2a   : > { %684 = vrot.lane.b32.xlu1 %v3056_v7, %s2927_s11  ;;  %4527 = vst [vmem:[#allocation8_spill] sm:$0xff] %v3149_v37  ;;  %4528 = vst [vmem:[#allocation9_spill] sm:$0xff] %v3152_v38  ;;  %v3159_v39 = vld [vmem:[%s3029_s10 + $0x4a] sm:$0xff]  ;;  %v3162_v40 = vld [vmem:[%s3029_s10 + $0x52] sm:$0xff] }
  0x2b   : > { %4529 = vst [vmem:[#allocation10_spill] sm:$0xff] %v3159_v39  ;;  %4530 = vst [vmem:[#allocation11_spill] sm:$0xff] %v3162_v40  ;;  %v418_v41 = vld [vmem:[%s3029_s10 + $0x62] sm:$0xff]  ;;  %v419_v42 = vld [vmem:[%s3029_s10 + $0x6a] sm:$0xff] }
  0x2c   : > { %686 = vrot.lane.b32.xlu0 %v3059_v8, %s2927_s11  ;;  %v420_v43 = vld [vmem:[%s3029_s10 + $0x7a] sm:$0xff]  ;;  %v421_v44 = vld [vmem:[%s3029_s10 + $0x82] sm:$0xff]  ;;  %v422_v45 = vld [vmem:[%s3029_s10 + $0x92] sm:$0xff] }
  0x2d   : > { %v423_v46 = vld [vmem:[%s3029_s10 + $0x9a] sm:$0xff]  ;;  %v424_v47 = vld [vmem:[%s3029_s10 + $0xaa] sm:$0xff]  ;;  %v425_v48 = vld [vmem:[%s3029_s10 + $0xb2] sm:$0xff] }
  0x2e   : > { %688 = vrot.lane.b32.xlu1 %v3066_v9, %s2927_s11  ;;  %v426_v49 = vld [vmem:[%s3029_s10 + $0xc2] sm:$0xff]  ;;  %v427_v50 = vld [vmem:[%s3029_s10 + $0xca] sm:$0xff]  ;;  %v3189_v51 = vld [vmem:[%s3029_s10 + $0xda] sm:$0xff] }
  0x2f   : > { %v3192_v52 = vld [vmem:[%s3029_s10 + $0xe2] sm:$0xff]  ;;  %v3199_v53 = vld [vmem:[%s3029_s10 + $0xf2] sm:$0xff]  ;;  %v3202_v54 = vld [vmem:[%s3029_s10 + $0xfa] sm:$0xff] }
  0x30   : > { %690 = vrot.lane.b32.xlu0 %v387_v10, %s2927_s11  ;;  %4531 = vst [vmem:[#allocation12_spill] sm:$0xff] %v3199_v53  ;;  %4532 = vst [vmem:[#allocation13_spill] sm:$0xff] %v3202_v54  ;;  %v3209_v55 = vld [vmem:[%s3029_s10 + $0x10a] sm:$0xff]  ;;  %v3212_v56 = vld [vmem:[%s3029_s10 + $0x112] sm:$0xff] }
  0x31   : > { %4533 = vst [vmem:[#allocation14_spill] sm:$0xff] %v3209_v55  ;;  %4534 = vst [vmem:[#allocation15_spill] sm:$0xff] %v3212_v56  ;;  %v3241_v63 = vld [vmem:[%s3029_s10 + $0x122] sm:$0xff]  ;;  %v287_v1 = vld [vmem:[%s4483_s1 + $0x1c] sm:$0xf] }
  0x32   : > { %692 = vrot.lane.b32.xlu1 %v388_v11, %s2927_s11  ;;  %4535 = vst [vmem:[#allocation16_spill] sm:$0xff] %v3241_v63  ;;  %v3250_v2 = vld [vmem:[%s3029_s10 + $0x12a] sm:$0xff]  ;;  %v2441_v10 = vld [vmem:[%s274_s24] ss:$0 sm:$0xff]  ;;  %s2929_s24 = smov 12  }
  0x33   : > { %4536 = vst [vmem:[#allocation17_spill] sm:$0xff] %v3250_v2  ;;  %v288_v11 = vld [vmem:[%s4483_s1 + $0x20] sm:$0xf] }
  0x34   : > { %694 = vrot.lane.b32.xlu0 %v389_v12, %s2927_s11 }
  0x36   : > { %696 = vrot.lane.b32.xlu1 %v390_v13, %s2927_s11 }
  0x38   : > { %698 = vrot.lane.b32.xlu0 %v391_v14, %s2927_s11 }
  0x3a   : > { %700 = vrot.lane.b32.xlu1 %v392_v15, %s2927_s11 }
  0x3c   : > { %702 = vrot.lane.b32.xlu0 %v393_v16, %s2927_s11 }
  0x3e   : > { %704 = vrot.lane.b32.xlu1 %v394_v17, %s2927_s11 }
  0x40   : > { %706 = vrot.lane.b32.xlu0 %v395_v18, %s2927_s11 }
  0x42   : > { %708 = vrot.lane.b32.xlu1 %v3089_v19, %s2927_s11 }
  0x44   : > { %710 = vrot.lane.b32.xlu0 %v3092_v20, %s2927_s11 }
  0x46   : > { %712 = vrot.lane.b32.xlu1 %v3099_v21, %s2927_s11 }
  0x48   : > { %714 = vrot.lane.b32.xlu0 %v3102_v22, %s2927_s11 }
  0x4a   : > { %716 = vrot.lane.b32.xlu1 %v3109_v23, %s2927_s11 }
  0x4c   : > { %718 = vrot.lane.b32.xlu0 %v3112_v24, %s2927_s11  ;;  %v3468_v24 = vld [vmem:[%s3029_s10 + $0x150] sm:$0xff] }
  0x4e   : > { %720 = vrot.lane.b32.xlu1 %v402_v25, %s2927_s11 }
  0x50   : > { %722 = vrot.lane.b32.xlu0 %v403_v26, %s2927_s11 }
  0x52   : > { %724 = vrot.lane.b32.xlu1 %v404_v27, %s2927_s11  ;;  %v436_v27 = vld [vmem:[%s3029_s10 + $0x13a] sm:$0xff] }
  0x54   : > { %726 = vrot.lane.b32.xlu0 %v405_v28, %s2927_s11 }
  0x56   : > { %728 = vrot.lane.b32.xlu1 %v406_v29, %s2927_s11 }
  0x58   : > { %730 = vrot.lane.b32.xlu0 %v407_v30, %s2927_s11 }
  0x5a   : > { %732 = vrot.lane.b32.xlu1 %v408_v31, %s2927_s11 }
  0x5c   : > { %734 = vrot.lane.b32.xlu0 %v409_v32, %s2927_s11 }
  0x5e   : > { %800 = vrot.lane.b32.xlu1 %v410_v33, %s2928_s12  ;;  %v437_v33 = vld [vmem:[%s3029_s10 + $0x142] sm:$0xff] }
  0x60   : > { %802 = vrot.lane.b32.xlu0 %v411_v34, %s2928_s12 }
  0x62   : > { %804 = vrot.lane.b32.xlu1 %v3139_v35, %s2928_s12 }
  0x64   : > { %806 = vrot.lane.b32.xlu0 %v3142_v36, %s2928_s12 }
  0x66   : > { %808 = vrot.lane.b32.xlu1 %v3149_v37, %s2928_s12 }
  0x68   : > { %810 = vrot.lane.b32.xlu0 %v3152_v38, %s2928_s12 }
  0x6a   : > { %812 = vrot.lane.b32.xlu1 %v3159_v39, %s2928_s12 }
  0x6c   : > { %814 = vrot.lane.b32.xlu0 %v3162_v40, %s2928_s12 }
  0x6e   : > { %816 = vrot.lane.b32.xlu1 %v418_v41, %s2928_s12 }
  0x70   : > { %818 = vrot.lane.b32.xlu0 %v419_v42, %s2928_s12 }
  0x72   : > { %820 = vrot.lane.b32.xlu1 %v420_v43, %s2928_s12 }
  0x74   : > { %822 = vrot.lane.b32.xlu0 %v421_v44, %s2928_s12 }
  0x76   : > { %824 = vrot.lane.b32.xlu1 %v422_v45, %s2928_s12 }
  0x78   : > { %826 = vrot.lane.b32.xlu0 %v423_v46, %s2928_s12 }
  0x7a   : > { %828 = vrot.lane.b32.xlu1 %v424_v47, %s2928_s12 }
  0x7c   : > { %830 = vrot.lane.b32.xlu0 %v425_v48, %s2928_s12 }
  0x7e   : > { %832 = vrot.lane.b32.xlu1 %v426_v49, %s2928_s12 }
  0x80   : > { %834 = vrot.lane.b32.xlu0 %v427_v50, %s2928_s12  ;;  %v438_v50 = vld [vmem:[%s3029_s10 + $0x152] sm:$0xff] }
  0x82   : > { %836 = vrot.lane.b32.xlu1 %v3189_v51, %s2928_s12 }
  0x84   : > { %838 = vrot.lane.b32.xlu0 %v3192_v52, %s2928_s12 }
  0x86   : > { %840 = vrot.lane.b32.xlu1 %v3199_v53, %s2928_s12 }
  0x88   : > { %842 = vrot.lane.b32.xlu0 %v3202_v54, %s2928_s12  ;;  %v3473_v54 = vld [vmem:[%s3029_s10 + $0x158] sm:$0xff] }
  0x89   : > { %4556 = vst [vmem:[#allocation37_spill] sm:$0xff] %v3473_v54 }
  0x8a   : > { %844 = vrot.lane.b32.xlu1 %v3209_v55, %s2928_s12  ;;  %v3459_v55 = vld [vmem:[%s3029_s10 + $0x140] sm:$0xff] }
  0x8c   : > { %846 = vrot.lane.b32.xlu0 %v3212_v56, %s2928_s12  ;;  %v3454_v56 = vld [vmem:[%s3029_s10 + $0x138] sm:$0xff] }
  0x8e   : > { %v296_v12 = vpop.permute.xlu0 %295  ;;  %848 = vrot.lane.b32.xlu1 %v3241_v63, %s2928_s12 }
  0x8f   : > { %v297_v13 = vmul.f32 %v296_v12, %v280_v57  ;;  %v298_v14 = vmul.f32 %v296_v12, %v281_v58  ;;  %v299_v15 = vmul.f32 %v296_v12, %v282_v59  ;;  %v300_v16 = vmul.f32 %v296_v12, %v283_v60  ;;  %v439_v59 = vld [vmem:[%s3029_s10 + $0x15a] sm:$0xff] }
  0x90   : > { %v301_v17 = vmul.f32 %v296_v12, %v284_v61  ;;  %v302_v18 = vmul.f32 %v296_v12, %v285_v62  ;;  %v303_v25 = vmul.f32 %v296_v12, %v286_v0  ;;  %v304_v26 = vmul.f32 %v296_v12, %v287_v1  ;;  %850 = vrot.lane.b32.xlu0 %v3250_v2, %s2928_s12  ;;  %v3260_v32 = vpop.permute.xlu1 %674  ;;  %v440_v62 = vld [vmem:[%s3029_s10 + $0x16a] sm:$0xff] }
  0x91   : > { %v305_v28 = vmul.f32 %v296_v12, %v288_v11  ;;  %v313_v29 = vmul.f32 %v2441_v10, %v297_v13  ;;  %v314_v30 = vmul.f32 %v2441_v10, %v298_v14  ;;  %v315_v31 = vmul.f32 %v2441_v10, %v299_v15  ;;  %4537 = vst [vmem:[#allocation18_spill] sm:$0xff] %v3260_v32  ;;  %v3286_v14 = vld [vmem:[%s3029_s10 + $0x18] sm:$0xff]  ;;  %v3431_v32 = vld [vmem:[%s3029_s10 + $0x110] sm:$0xff]  ;;  %v3445_v2 = vld [vmem:[%s3029_s10 + $0x128] sm:$0xff] }
  0x92   : > { %v316_v34 = vmul.f32 %v2441_v10, %v300_v16  ;;  %v317_v41 = vmul.f32 %v2441_v10, %v301_v17  ;;  %v318_v42 = vmul.f32 %v2441_v10, %v302_v18  ;;  %v319_v43 = vmul.f32 %v2441_v10, %v303_v25  ;;  %v3263_v44 = vpop.permute.xlu0 %672  ;;  %852 = vrot.lane.b32.xlu1 %v436_v27, %s2928_s12  ;;  %v3292_v16 = vld [vmem:[%s3029_s10 + $0x20] sm:$0xff]  ;;  %v3303_v18 = vld [vmem:[%s3029_s10 + $0x30] sm:$0xff] }
  0x93   : > { %4538 = vst [vmem:[#allocation19_spill] sm:$0xff] %v3263_v44  ;;  %v320_v45 = vmul.f32 %v2441_v10, %v304_v26  ;;  %v321_v46 = vmul.f32 %v2441_v10, %v305_v28  ;;  %v330_v47 = vcombine.low %v313_v29, %v314_v30  ;;  %v441_v10 = vld [vmem:[%s3029_s10 + $0x172] sm:$0xff]  ;;  %4541 = vst [vmem:[#allocation22_spill] sm:$0xff] %v3286_v14  ;;  %v3318_v28 = vld [vmem:[%s3029_s10 + $0x48] sm:$0xff] }
  0x94   : > { %v331_v48 = vcombine.low %v315_v31, %v316_v34  ;;  %v332_v49 = vcombine.low %v317_v41, %v318_v42  ;;  %854 = vrot.lane.b32.xlu0 %v437_v33, %s2928_s12  ;;  %v3268_v58 = vpop.permute.xlu1 %676  ;;  %4542 = vst [vmem:[#allocation23_spill] sm:$0xff] %v3292_v16  ;;  %v3309_v26 = vld [vmem:[%s3029_s10 + $0x38] sm:$0xff]  ;;  %v3323_v30 = vld [vmem:[%s3029_s10 + $0x50] sm:$0xff]  ;;  %v3332_v33 = vld [vmem:[%s3029_s10 + $0x60] sm:$0xff] }
  0x95   : > { %v333_v57 = vcombine.low %v319_v43, %v320_v45  ;;  %342 = vst [vmem:[#allocation2 + $0x20] sm:$0xf] %v321_v46  ;;  %4539 = vst [vmem:[#allocation20_spill] sm:$0xff] %v3268_v58  ;;  %v3337_v41 = vld [vmem:[%s3029_s10 + $0x68] sm:$0xff]  ;;  %v361_v43 = vld [vmem:[%s3029_s10 + $0xb0] sm:$0xff] }
  0x96   : > { %v3271_v60 = vpop.permute.xlu0 %678  ;;  %v2768_v61 = vpack.c.bf16 %v331_v48, %v330_v47  ;;  %856 = vrot.lane.b32.xlu1 %v438_v50, %s2928_s12  ;;  %v360_v42 = vld [vmem:[%s3029_s10 + $0xa8] sm:$0xff]  ;;  %v3346_v46 = vld [vmem:[%s3029_s10 + $0x78] sm:$0xff] }
  0x97   : > { %4540 = vst [vmem:[#allocation21_spill] sm:$0xff] %v3271_v60  ;;  %v2772_v0 = vpack.c.bf16 %v333_v57, %v332_v49  ;;  %v3352_v49 = vld [vmem:[%s3029_s10 + $0x80] sm:$0xff] }
  0x98   : > { %858 = vrot.lane.b32.xlu0 %v439_v59, %s2928_s12  ;;  %2769 = vmatprep.subr.bf16.mxu0 %v2768_v61  ;;  %v3276_v1 = vpop.permute.xlu1 %680  ;;  %v3364_v59 = vld [vmem:[%s3029_s10 + $0x90] sm:$0xff]  ;;  %v3403_v60 = vld [vmem:[%s3029_s10 + $0xe0] sm:$0xff] }
  0x99   : > { %2776 = vmatprep.subr.bf16.mxu1 %v2768_v61  ;;  %2771 = vmatpush3.bf16.msra.mxu0 %v2768_v61  ;;  %4550 = vst [vmem:[#allocation31_spill] sm:$0xff] %v3403_v60  ;;  %v1669_v53 = vsel %vm1664_vm1, %v3303_v18, %v3276_v1 }
  0x9a   : > { %v3279_v11 = vpop.permute.xlu0 %682  ;;  %2779 = vmatpush3.bf16.msra.mxu1 %v2768_v61  ;;  %2773 = vmatprep.subr.bf16.mxu0 %v2772_v0 }
  0x9b   : > { %860 = vrot.lane.b32.xlu1 %v440_v62, %s2928_s12  ;;  %2777 = vmatprep.subr.bf16.mxu1 %v2772_v0  ;;  %v3369_v62 = vld [vmem:[%s3029_s10 + $0x98] sm:$0xff] }
  0x9c   : > { %862 = vrot.lane.b32.xlu0 %v441_v10, %s2928_s12  ;;  %v3283_v12 = vpop.permute.xlu1 %684  ;;  %v1932_v13 = vld [vmem:[#allocation2 + $0x20] sm:$0xf] }
  0x9d   : > { %2775 = vmatpush3.bf16.msra.mxu0 %v2772_v0  ;;  %v1671_v1 = vsel %vm1664_vm1, %v3318_v28, %v3283_v12 }
  0x9e   : > { %v3288_v15 = vpop.permute.xlu0 %686  ;;  %2780 = vmatpush3.bf16.msra.mxu1 %v2772_v0  ;;  %2718 = vmatprep.subr.msk.mxu0 %vm2030_vm0, %v1932_v13 }
  0x9f   : > { %928 = vrot.lane.b32.xlu1 %v3286_v14, %s2929_s24  ;;  %2778 = vmatprep.subr.msk.mxu1 %vm2030_vm0, %v1932_v13  ;;  %v3412_v14 = vld [vmem:[%s3029_s10 + $0xf0] sm:$0xff] }
  0xa0   : > { %930 = vrot.lane.b32.xlu0 %v3292_v16, %s2929_s24  ;;  %v3299_v17 = vpop.permute.xlu1 %688  ;;  %v3389_v16 = vld [vmem:[%s3029_s10 + $0xc8] sm:$0xff] }
  0xa1   : > { %2719 = vmatpush3.msk.msra.mxu0 %vm2030_vm0, %v1932_v13  ;;  %4548 = vst [vmem:[#allocation29_spill] sm:$0xff] %v3389_v16 }
  0xa2   : > { %v3305_v25 = vpop.permute.xlu0 %690  ;;  %2781 = vmatpush3.msk.msra.mxu1 %vm2030_vm0, %v1932_v13 }
  0xa3   : > { %932 = vrot.lane.b32.xlu1 %v3303_v18, %s2929_s24 }
  0xa4   : > { %934 = vrot.lane.b32.xlu0 %v3309_v26, %s2929_s24  ;;  %v3315_v27 = vpop.permute.xlu1 %692 }
  0xa6   : > { %v3320_v29 = vpop.permute.xlu0 %694 }
  0xa7   : > { %936 = vrot.lane.b32.xlu1 %v3318_v28, %s2929_s24 }
  0xa8   : > { %938 = vrot.lane.b32.xlu0 %v3323_v30, %s2929_s24  ;;  %v3329_v31 = vpop.permute.xlu1 %696 }
  0xaa   : > { %v3334_v34 = vpop.permute.xlu0 %698 }
  0xab   : > { %940 = vrot.lane.b32.xlu1 %v3332_v33, %s2929_s24 }
  0xac   : > { %942 = vrot.lane.b32.xlu0 %v3337_v41, %s2929_s24  ;;  %v701_v45 = vpop.permute.xlu1 %700 }
  0xad   : > { %v3349_v47 = vsel %vm1664_vm1, %v360_v42, %v701_v45  ;;  %v3384_v45 = vld [vmem:[%s3029_s10 + $0xc0] sm:$0xff] }
  0xae   : > { %v703_v48 = vpop.permute.xlu0 %702  ;;  %4547 = vst [vmem:[#allocation28_spill] sm:$0xff] %v3384_v45 }
  0xaf   : > { %944 = vrot.lane.b32.xlu1 %v3346_v46, %s2929_s24  ;;  %v3357_v50 = vsel %vm1664_vm1, %v361_v43, %v703_v48 }
  0xb0   : > { %946 = vrot.lane.b32.xlu0 %v3352_v49, %s2929_s24  ;;  %v3361_v57 = vpop.permute.xlu1 %704 }
  0xb1   : > { %4543 = vst [vmem:[#allocation24_spill] sm:$0xff] %v3361_v57  ;;  %v3440_v57 = vld [vmem:[%s3029_s10 + $0x120] sm:$0xff] }
  0xb2   : > { %v3366_v61 = vpop.permute.xlu0 %706 }
  0xb3   : > { %4544 = vst [vmem:[#allocation25_spill] sm:$0xff] %v3366_v61  ;;  %948 = vrot.lane.b32.xlu1 %v3364_v59, %s2929_s24 }
  0xb4   : > { %950 = vrot.lane.b32.xlu0 %v3369_v62, %s2929_s24  ;;  %v3375_v0 = vpop.permute.xlu1 %708 }
  0xb5   : > { %4545 = vst [vmem:[#allocation26_spill] sm:$0xff] %v3375_v0 }
  0xb6   : > { %v3377_v10 = vpop.permute.xlu0 %710 }
  0xb7   : > { %4546 = vst [vmem:[#allocation27_spill] sm:$0xff] %v3377_v10  ;;  %952 = vrot.lane.b32.xlu1 %v360_v42, %s2929_s24 }
  0xb8   : > { %954 = vrot.lane.b32.xlu0 %v361_v43, %s2929_s24  ;;  %v3381_v13 = vpop.permute.xlu1 %712  ;;  %v3398_v43 = vld [vmem:[%s3029_s10 + $0xd8] sm:$0xff] }
  0xb9   : > { %4549 = vst [vmem:[#allocation30_spill] sm:$0xff] %v3398_v43 }
  0xba   : > { %v3386_v48 = vpop.permute.xlu0 %714 }
  0xbb   : > { %956 = vrot.lane.b32.xlu1 %v3384_v45, %s2929_s24 }
  0xbc   : > { %958 = vrot.lane.b32.xlu0 %v3389_v16, %s2929_s24  ;;  %v3395_v42 = vpop.permute.xlu1 %716  ;;  %v3417_v16 = vld [vmem:[%s3029_s10 + $0xf8] sm:$0xff] }
  0xbe   : > { %v3400_v10 = vpop.permute.xlu0 %718 }
  0xbf   : > { %960 = vrot.lane.b32.xlu1 %v3398_v43, %s2929_s24 }
  0xc0   : > { %962 = vrot.lane.b32.xlu0 %v3403_v60, %s2929_s24  ;;  %v3409_v0 = vpop.permute.xlu1 %720  ;;  %v3426_v60 = vld [vmem:[%s3029_s10 + $0x108] sm:$0xff] }
  0xc2   : > { %v3414_v58 = vpop.permute.xlu0 %722 }
  0xc3   : > { %964 = vrot.lane.b32.xlu1 %v3412_v14, %s2929_s24 }
  0xc4   : > { %966 = vrot.lane.b32.xlu0 %v3417_v16, %s2929_s24  ;;  %v3423_v43 = vpop.permute.xlu1 %724 }
  0xc6   : > { %v3428_v61 = vpop.permute.xlu0 %726 }
  0xc7   : > { %968 = vrot.lane.b32.xlu1 %v3426_v60, %s2929_s24 }
  0xc8   : > { %970 = vrot.lane.b32.xlu0 %v3431_v32, %s2929_s24  ;;  %v3437_v45 = vpop.permute.xlu1 %728 }
  0xca   : > { %v3442_v44 = vpop.permute.xlu0 %730 }
  0xcb   : > { %4551 = vst [vmem:[#allocation32_spill] sm:$0xff] %v3442_v44  ;;  %972 = vrot.lane.b32.xlu1 %v3440_v57, %s2929_s24 }
  0xcc   : > { %974 = vrot.lane.b32.xlu0 %v3445_v2, %s2929_s24  ;;  %v3451_v63 = vpop.permute.xlu1 %732 }
  0xcd   : > { %4552 = vst [vmem:[#allocation33_spill] sm:$0xff] %v3451_v63 }
  0xce   : > { %v3456_v40 = vpop.permute.xlu0 %734 }
  0xcf   : > { %4553 = vst [vmem:[#allocation34_spill] sm:$0xff] %v3456_v40  ;;  %976 = vrot.lane.b32.xlu1 %v3454_v56, %s2929_s24  ;;  %v3482_v40 = vld [vmem:[%s3029_s10 + $0x168] sm:$0xff] }
  0xd0   : > { %978 = vrot.lane.b32.xlu0 %v3459_v55, %s2929_s24  ;;  %v3465_v39 = vpop.permute.xlu1 %800  ;;  %4558 = vst [vmem:[#allocation39_spill] sm:$0xff] %v3482_v40 }
  0xd1   : > { %4554 = vst [vmem:[#allocation35_spill] sm:$0xff] %v3465_v39  ;;  %v3487_v39 = vld [vmem:[%s3029_s10 + $0x170] sm:$0xff] }
  0xd2   : > { %v3470_v23 = vpop.permute.xlu0 %802  ;;  %4560 = vst [vmem:[#allocation41_spill] sm:$0xff] %v3487_v39 }
  0xd3   : > { %4555 = vst [vmem:[#allocation36_spill] sm:$0xff] %v3470_v23  ;;  %980 = vrot.lane.b32.xlu1 %v3468_v24, %s2929_s24  ;;  %v2472_v23 = vld [vmem:[%s3029_s10 + $0x180] sm:$0xff] }
  0xd4   : > { %982 = vrot.lane.b32.xlu0 %v3473_v54, %s2929_s24  ;;  %v3479_v38 = vpop.permute.xlu1 %804 }
  0xd5   : > { %4557 = vst [vmem:[#allocation38_spill] sm:$0xff] %v3479_v38  ;;  %v2473_v38 = vld [vmem:[%s3029_s10 + $0x188] sm:$0xff] }
  0xd6   : > { %v3484_v63 = vpop.permute.xlu0 %806 }
  0xd7   : > { %4559 = vst [vmem:[#allocation40_spill] sm:$0xff] %v3484_v63  ;;  %984 = vrot.lane.b32.xlu1 %v3482_v40, %s2929_s24  ;;  %v1670_v63 = vsel %vm1664_vm1, %v3309_v26, %v3279_v11  ;;  %v1672_v11 = vsel %vm1664_vm1, %v3323_v30, %v3288_v15 }
  0xd8   : > { %986 = vrot.lane.b32.xlu0 %v3487_v39, %s2929_s24  ;;  %v809_v37 = vpop.permute.xlu1 %808 }
  0xd9   : > { %v3502_v54 = vsel %vm1697_vm2, %v1669_v53, %v809_v37 }
  0xda   : > { %v811_v44 = vpop.permute.xlu0 %810 }
  0xdb   : > { %988 = vrot.lane.b32.xlu1 %v2472_v23, %s2929_s24  ;;  %v3506_v39 = vsel %vm1697_vm2, %v1670_v63, %v811_v44 }
  0xdc   : > { %990 = vrot.lane.b32.xlu0 %v2473_v38, %s2929_s24  ;;  %v813_v40 = vpop.permute.xlu1 %812  ;;  %v1673_v38 = vsel %vm1664_vm1, %v3332_v33, %v3299_v17  ;;  %v1676_v17 = vsel %vm1664_vm1, %v3352_v49, %v3320_v29  ;;  %v1678_v29 = vsel %vm1664_vm1, %v3369_v62, %v3334_v34  ;;  %s2935_s24 = smov [#allocation3]  }
  0xdd   : > { %v3516_v37 = vsel %vm1697_vm2, %v1671_v1, %v813_v40  ;;  %v1674_v40 = vsel %vm1664_vm1, %v3337_v41, %v3305_v25 }
  0xde   : > { %v815_v53 = vpop.permute.xlu0 %814 }
  0xdf   : > { %1056 = vrot.lane.b32.xlu1 %v3036_v3, %s2930_s6  ;;  %v3521_v23 = vsel %vm1697_vm2, %v1672_v11, %v815_v53 }
  0xe0   : > { %1058 = vrot.lane.b32.xlu0 %v3039_v4, %s2930_s6  ;;  %v817_v63 = vpop.permute.xlu1 %816  ;;  %v1675_v4 = vsel %vm1664_vm1, %v3346_v46, %v3315_v27  ;;  %v1677_v27 = vsel %vm1664_vm1, %v3364_v59, %v3329_v31 }
  0xe1   : > { %v3532_v44 = vsel %vm1697_vm2, %v1673_v38, %v817_v63 }
  0xe2   : > { %v819_v12 = vpop.permute.xlu0 %818 }
  0xe3   : > { %1060 = vrot.lane.b32.xlu1 %v3046_v5, %s2930_s6  ;;  %v3537_v3 = vsel %vm1697_vm2, %v1674_v40, %v819_v12 }
  0xe4   : > { %1062 = vrot.lane.b32.xlu0 %v3049_v6, %s2930_s6  ;;  %v821_v15 = vpop.permute.xlu1 %820 }
  0xe5   : > { %v3548_v25 = vsel %vm1697_vm2, %v1675_v4, %v821_v15 }
  0xe6   : > { %v823_v1 = vpop.permute.xlu0 %822 }
  0xe7   : > { %1064 = vrot.lane.b32.xlu1 %v3056_v7, %s2930_s6  ;;  %v3553_v11 = vsel %vm1697_vm2, %v1676_v17, %v823_v1 }
  0xe8   : > { %1066 = vrot.lane.b32.xlu0 %v3059_v8, %s2930_s6  ;;  %v825_v53 = vpop.permute.xlu1 %824 }
  0xe9   : > { %v3564_v38 = vsel %vm1697_vm2, %v1677_v27, %v825_v53 }
  0xea   : > { %v827_v63 = vpop.permute.xlu0 %826 }
  0xeb   : > { %1068 = vrot.lane.b32.xlu1 %v3066_v9, %s2930_s6  ;;  %v3569_v40 = vsel %vm1697_vm2, %v1678_v29, %v827_v63 }
  0xec   : > { %1088 = vrot.lane.b32.xlu0 %v3089_v19, %s2930_s6  ;;  %v829_v12 = vpop.permute.xlu1 %828 }
  0xed   : > { %v3575_v31 = vsel %vm1697_vm2, %v3349_v47, %v829_v12 }
  0xee   : > { %v831_v4 = vpop.permute.xlu0 %830 }
  0xef   : > { %1090 = vrot.lane.b32.xlu1 %v3092_v20, %s2930_s6  ;;  %v3581_v34 = vsel %vm1697_vm2, %v3357_v50, %v831_v4  ;;  %v4561_v4 = vld [vmem:[#allocation32_spill] sm:$0xff] }
  0xf0   : > { %1184 = vrot.lane.b32.xlu0 %v3139_v35, %s2931_s7  ;;  %v3585_v9 = vpop.permute.xlu1 %832  ;;  %v1685_v35 = vsel %vm1664_vm1, %v3412_v14, %v3381_v13 }
  0xf2   : > { %v3587_v19 = vpop.permute.xlu0 %834 }
  0xf3   : > { %1216 = vrot.lane.b32.xlu1 %v3189_v51, %s2931_s7 }
  0xf4   : > { %1186 = vrot.lane.b32.xlu0 %v3142_v36, %s2931_s7  ;;  %v3593_v47 = vpop.permute.xlu1 %836  ;;  %v1686_v36 = vsel %vm1664_vm1, %v3417_v16, %v3386_v48  ;;  %v1688_v48 = vsel %vm1664_vm1, %v3431_v32, %v3400_v10  ;;  %v1690_v10 = vsel %vm1664_vm1, %v3445_v2, %v3414_v58  ;;  %v1692_v58 = vsel %vm1664_vm1, %v3459_v55, %v3428_v61  ;;  %v4562_v61 = vld [vmem:[#allocation37_spill] sm:$0xff] }
  0xf6   : > { %v3595_v20 = vpop.permute.xlu0 %838 }
  0xf7   : > { %1218 = vrot.lane.b32.xlu1 %v3192_v52, %s2931_s7 }
  0xf8   : > { %1312 = vrot.lane.b32.xlu0 %v3303_v18, %s2932_s8  ;;  %v841_v50 = vpop.permute.xlu1 %840  ;;  %v1687_v18 = vsel %vm1664_vm1, %v3426_v60, %v3395_v42 }
  0xf9   : > { %v3608_v51 = vsel %vm1697_vm2, %v1685_v35, %v841_v50  ;;  %v1694_v35 = vsel %vm1664_vm1, %v4562_v61, %v4561_v4 }
  0xfa   : > { %v843_v15 = vpop.permute.xlu0 %842 }
  0xfb   : > { %1344 = vrot.lane.b32.xlu1 %v3412_v14, %s2932_s8  ;;  %v3613_v52 = vsel %vm1697_vm2, %v1686_v36, %v843_v15 }
  0xfc   : > { %1314 = vrot.lane.b32.xlu0 %v3309_v26, %s2932_s8  ;;  %v845_v13 = vpop.permute.xlu1 %844  ;;  %v1689_v26 = vsel %vm1664_vm1, %v3440_v57, %v3409_v0 }
  0xfd   : > { %v3624_v17 = vsel %vm1697_vm2, %v1687_v18, %v845_v13  ;;  %v4564_v18 = vld [vmem:[#allocation12_spill] sm:$0xff]  ;;  %v4566_v13 = vld [vmem:[#allocation39_spill] sm:$0xff] }
  0xfe   : > { %v847_v1 = vpop.permute.xlu0 %846 }
  0xff   : > { %1346 = vrot.lane.b32.xlu1 %v3417_v16, %s2932_s8  ;;  %v3629_v14 = vsel %vm1697_vm2, %v1688_v48, %v847_v1 }
 0x100   : > { %1440 = vrot.lane.b32.xlu0 %v3046_v5, %s2933_s9  ;;  %v849_v42 = vpop.permute.xlu1 %848  ;;  %v1691_v5 = vsel %vm1664_vm1, %v3454_v56, %v3423_v43 }
 0x101   : > { %v3640_v27 = vsel %vm1697_vm2, %v1689_v26, %v849_v42  ;;  %v4567_v26 = vld [vmem:[#allocation34_spill] sm:$0xff]  ;;  %v4568_v42 = vld [vmem:[#allocation41_spill] sm:$0xff] }
 0x102   : > { %v851_v16 = vpop.permute.xlu0 %850 }
 0x103   : > { %1472 = vrot.lane.b32.xlu1 %v3099_v21, %s2933_s9  ;;  %v3645_v53 = vsel %vm1697_vm2, %v1690_v10, %v851_v16  ;;  %v1696_v10 = vsel %vm1664_vm1, %v4568_v42, %v4567_v26 }
 0x104   : > { %1092 = vrot.lane.b32.xlu0 %v3099_v21, %s2930_s6  ;;  %v853_v0 = vpop.permute.xlu1 %852  ;;  %v1693_v21 = vsel %vm1664_vm1, %v3468_v24, %v3437_v45  ;;  %v4565_v45 = vld [vmem:[#allocation33_spill] sm:$0xff] }
 0x105   : > { %v3656_v29 = vsel %vm1697_vm2, %v1691_v5, %v853_v0  ;;  %v1695_v48 = vsel %vm1664_vm1, %v4566_v13, %v4565_v45 }
 0x106   : > { %v855_v63 = vpop.permute.xlu0 %854 }
 0x107   : > { %1442 = vrot.lane.b32.xlu1 %v3049_v6, %s2933_s9  ;;  %v3661_v12 = vsel %vm1697_vm2, %v1692_v58, %v855_v63  ;;  %v4563_v6 = vld [vmem:[#allocation8_spill] sm:$0xff] }
 0x108   : > { %1474 = vrot.lane.b32.xlu0 %v3102_v22, %s2933_s9  ;;  %v857_v43 = vpop.permute.xlu1 %856 }
 0x109   : > { %v3672_v50 = vsel %vm1697_vm2, %v1693_v21, %v857_v43  ;;  %v4569_v21 = vld [vmem:[#allocation9_spill] sm:$0xff] }
 0x10a   : > { %v859_v36 = vpop.permute.xlu0 %858 }
 0x10b   : > { %1568 = vrot.lane.b32.xlu1 %v4563_v6, %s2934_s29  ;;  %v3677_v15 = vsel %vm1697_vm2, %v1694_v35, %v859_v36 }
 0x10c   : > { %1600 = vrot.lane.b32.xlu0 %v4564_v18, %s2934_s29 }
 0x10d   : > { %v861_v1 = vpop.permute.xlu1 %860 }
 0x10e   : > { %v3688_v16 = vsel %vm1697_vm2, %v1695_v48, %v861_v1  ;;  %v863_v5 = vpop.permute.xlu0 %862 }
 0x10f   : > { %1094 = vrot.lane.b32.xlu1 %v3102_v22, %s2930_s6  ;;  %v3693_v0 = vsel %vm1697_vm2, %v1696_v10, %v863_v5  ;;  %v4570_v22 = vld [vmem:[#allocation13_spill] sm:$0xff]  ;;  %v4576_v5 = vld [vmem:[#allocation7_spill] sm:$0xff] }
 0x110   : > { %1188 = vrot.lane.b32.xlu0 %v4563_v6, %s2931_s7 }
 0x111   : > { %v3697_v58 = vpop.permute.xlu1 %928 }
 0x112   : > { %v3699_v63 = vpop.permute.xlu0 %930 }
 0x113   : > { %1220 = vrot.lane.b32.xlu1 %v4564_v18, %s2931_s7 }
 0x114   : > { %1570 = vrot.lane.b32.xlu0 %v4569_v21, %s2934_s29 }
 0x115   : > { %v3705_v43 = vpop.permute.xlu1 %932 }
 0x116   : > { %v3707_v4 = vpop.permute.xlu0 %934 }
 0x117   : > { %1602 = vrot.lane.b32.xlu1 %v4570_v22, %s2934_s29 }
 0x118   : > { %1190 = vrot.lane.b32.xlu0 %v4569_v21, %s2931_s7 }
 0x119   : > { %v937_v35 = vpop.permute.xlu1 %936 }
 0x11a   : > { %v3715_v36 = vsel %vm1730_vm3, %v3502_v54, %v937_v35  ;;  %v939_v6 = vpop.permute.xlu0 %938 }
 0x11b   : > { %1222 = vrot.lane.b32.xlu1 %v4570_v22, %s2931_s7  ;;  %v3721_v18 = vsel %vm1730_vm3, %v3506_v39, %v939_v6 }
 0x11c   : > { %1316 = vrot.lane.b32.xlu0 %v3318_v28, %s2932_s8 }
 0x11d   : > { %v941_v45 = vpop.permute.xlu1 %940 }
 0x11e   : > { %v3727_v48 = vsel %vm1730_vm3, %v3516_v37, %v941_v45  ;;  %v943_v1 = vpop.permute.xlu0 %942 }
 0x11f   : > { %1348 = vrot.lane.b32.xlu1 %v3426_v60, %s2932_s8  ;;  %v3733_v54 = vsel %vm1730_vm3, %v3521_v23, %v943_v1 }
 0x120   : > { %1318 = vrot.lane.b32.xlu0 %v3323_v30, %s2932_s8 }
 0x121   : > { %v945_v39 = vpop.permute.xlu1 %944 }
 0x122   : > { %v3739_v28 = vsel %vm1730_vm3, %v3532_v44, %v945_v39  ;;  %v947_v26 = vpop.permute.xlu0 %946  ;;  %v4572_v44 = vld [vmem:[#allocation6_spill] sm:$0xff] }
 0x123   : > { %1350 = vrot.lane.b32.xlu1 %v3431_v32, %s2932_s8  ;;  %v3745_v37 = vsel %vm1730_vm3, %v3537_v3, %v947_v26 }
 0x124   : > { %1444 = vrot.lane.b32.xlu0 %v3056_v7, %s2933_s9 }
 0x125   : > { %v949_v60 = vpop.permute.xlu1 %948 }
 0x126   : > { %v3751_v30 = vsel %vm1730_vm3, %v3548_v25, %v949_v60  ;;  %v951_v23 = vpop.permute.xlu0 %950  ;;  %v4582_v60 = vld [vmem:[#allocation15_spill] sm:$0xff] }
 0x127   : > { %4571 = vst [vmem:[#allocation32_spill] sm:$0xff] %v3751_v30  ;;  %1476 = vrot.lane.b32.xlu1 %v4572_v44, %s2933_s9  ;;  %v3757_v10 = vsel %vm1730_vm3, %v3553_v11, %v951_v23 }
 0x128   : > { %4573 = vst [vmem:[#allocation37_spill] sm:$0xff] %v3757_v10  ;;  %1096 = vrot.lane.b32.xlu0 %v4572_v44, %s2930_s6 }
 0x129   : > { %v953_v32 = vpop.permute.xlu1 %952 }
 0x12a   : > { %v3763_v7 = vsel %vm1730_vm3, %v3564_v38, %v953_v32  ;;  %v955_v3 = vpop.permute.xlu0 %954  ;;  %v4578_v38 = vld [vmem:[#allocation10_spill] sm:$0xff] }
 0x12b   : > { %4574 = vst [vmem:[#allocation8_spill] sm:$0xff] %v3763_v7  ;;  %1446 = vrot.lane.b32.xlu1 %v3059_v8, %s2933_s9  ;;  %v3769_v25 = vsel %vm1730_vm3, %v3569_v40, %v955_v3  ;;  %v4580_v8 = vld [vmem:[#allocation14_spill] sm:$0xff] }
 0x12c   : > { %4575 = vst [vmem:[#allocation12_spill] sm:$0xff] %v3769_v25  ;;  %1478 = vrot.lane.b32.xlu0 %v4576_v5, %s2933_s9  ;;  %v4592_v25 = vld [vmem:[#allocation24_spill] sm:$0xff] }
 0x12d   : > { %v957_v11 = vpop.permute.xlu1 %956 }
 0x12e   : > { %v3775_v21 = vsel %vm1730_vm3, %v3575_v31, %v957_v11  ;;  %v959_v22 = vpop.permute.xlu0 %958 }
 0x12f   : > { %4577 = vst [vmem:[#allocation33_spill] sm:$0xff] %v3775_v21  ;;  %1572 = vrot.lane.b32.xlu1 %v4578_v38, %s2934_s29  ;;  %v3781_v35 = vsel %vm1730_vm3, %v3581_v34, %v959_v22  ;;  %v4581_v34 = vld [vmem:[#allocation11_spill] sm:$0xff] }
 0x130   : > { %4579 = vst [vmem:[#allocation39_spill] sm:$0xff] %v3781_v35  ;;  %1604 = vrot.lane.b32.xlu0 %v4580_v8, %s2934_s29  ;;  %v2593_v35 = vld [vmem:[%s3029_s10 + $0x141] sm:$0xff]  ;;  %v4591_v21 = vld [vmem:[#allocation19_spill] sm:$0xff] }
 0x131   : > { %v3785_v40 = vpop.permute.xlu1 %960 }
 0x132   : > { %v3787_v6 = vpop.permute.xlu0 %962 }
 0x133   : > { %1098 = vrot.lane.b32.xlu1 %v4576_v5, %s2930_s6 }
 0x134   : > { %1192 = vrot.lane.b32.xlu0 %v4578_v38, %s2931_s7 }
 0x135   : > { %v3793_v31 = vpop.permute.xlu1 %964 }
 0x136   : > { %v3795_v45 = vpop.permute.xlu0 %966 }
 0x137   : > { %1224 = vrot.lane.b32.xlu1 %v4580_v8, %s2931_s7 }
 0x138   : > { %1574 = vrot.lane.b32.xlu0 %v4581_v34, %s2934_s29 }
 0x139   : > { %v969_v1 = vpop.permute.xlu1 %968 }
 0x13a   : > { %v3803_v39 = vsel %vm1730_vm3, %v3608_v51, %v969_v1  ;;  %v971_v26 = vpop.permute.xlu0 %970 }
 0x13b   : > { %1606 = vrot.lane.b32.xlu1 %v4582_v60, %s2934_s29  ;;  %v3809_v23 = vsel %vm1730_vm3, %v3613_v52, %v971_v26 }
 0x13c   : > { %1194 = vrot.lane.b32.xlu0 %v4581_v34, %s2931_s7  ;;  %v2591_v34 = vld [vmem:[%s3029_s10 + $0x129] sm:$0xff] }
 0x13d   : > { %v973_v44 = vpop.permute.xlu1 %972 }
 0x13e   : > { %v3815_v32 = vsel %vm1730_vm3, %v3624_v17, %v973_v44  ;;  %v975_v3 = vpop.permute.xlu0 %974 }
 0x13f   : > { %1226 = vrot.lane.b32.xlu1 %v4582_v60, %s2931_s7  ;;  %v3821_v51 = vsel %vm1730_vm3, %v3629_v14, %v975_v3  ;;  %v4589_v3 = vld [vmem:[#allocation16_spill] sm:$0xff] }
 0x140   : > { %1320 = vrot.lane.b32.xlu0 %v3332_v33, %s2932_s8  ;;  %v2574_v33 = vld [vmem:[%s3029_s10 + $0x61] sm:$0xff] }
 0x141   : > { %v977_v52 = vpop.permute.xlu1 %976 }
 0x142   : > { %v3827_v5 = vsel %vm1730_vm3, %v3640_v27, %v977_v52  ;;  %v979_v11 = vpop.permute.xlu0 %978 }
 0x143   : > { %1352 = vrot.lane.b32.xlu1 %v3440_v57, %s2932_s8  ;;  %v3833_v17 = vsel %vm1730_vm3, %v3645_v53, %v979_v11  ;;  %v2590_v53 = vld [vmem:[%s3029_s10 + $0x121] sm:$0xff] }
 0x144   : > { %1322 = vrot.lane.b32.xlu0 %v3337_v41, %s2932_s8 }
 0x145   : > { %v981_v14 = vpop.permute.xlu1 %980 }
 0x146   : > { %v3840_v22 = vsel %vm1730_vm3, %v3656_v29, %v981_v14  ;;  %v983_v27 = vpop.permute.xlu0 %982  ;;  %v2607_v14 = vld [vmem:[%s3029_s10 + $0x6a] sm:$0xff] }
 0x147   : > { %4583 = vst [vmem:[#allocation34_spill] sm:$0xff] %v3840_v22  ;;  %1354 = vrot.lane.b32.xlu1 %v3445_v2, %s2932_s8  ;;  %v3846_v57 = vsel %vm1730_vm3, %v3661_v12, %v983_v27  ;;  %v2575_v2 = vld [vmem:[%s3029_s10 + $0x69] sm:$0xff]  ;;  %v2624_v22 = vld [vmem:[%s3029_s10 + $0x13a] sm:$0xff] }
 0x148   : > { %4584 = vst [vmem:[#allocation41_spill] sm:$0xff] %v3846_v57  ;;  %1448 = vrot.lane.b32.xlu0 %v2574_v33, %s2933_s9 }
 0x149   : > { %v985_v41 = vpop.permute.xlu1 %984 }
 0x14a   : > { %v3852_v38 = vsel %vm1730_vm3, %v3672_v50, %v985_v41  ;;  %v987_v8 = vpop.permute.xlu0 %986 }
 0x14b   : > { %4585 = vst [vmem:[#allocation9_spill] sm:$0xff] %v3852_v38  ;;  %1480 = vrot.lane.b32.xlu1 %v2590_v53, %s2933_s9  ;;  %v3857_v29 = vsel %vm1730_vm3, %v3677_v15, %v987_v8  ;;  %v2606_v15 = vld [vmem:[%s3029_s10 + $0x62] sm:$0xff]  ;;  %v4593_v38 = vld [vmem:[#allocation28_spill] sm:$0xff] }
 0x14c   : > { %4586 = vst [vmem:[#allocation13_spill] sm:$0xff] %v3857_v29  ;;  %1100 = vrot.lane.b32.xlu0 %v2590_v53, %s2930_s6  ;;  %v4590_v53 = vld [vmem:[#allocation17_spill] sm:$0xff]  ;;  %v1681_v7 = vsel %vm1664_vm1, %v4593_v38, %v4592_v25 }
 0x14d   : > { %v989_v12 = vpop.permute.xlu1 %988  ;;  %v1714_v10 = vsel %vm1697_vm2, %v1681_v7, %v3585_v9  ;;  %v347_v7 = vld [vmem:[%s3029_s10 + $0x8] sm:$0xff] }
 0x14e   : > { %v3864_v1 = vsel %vm1730_vm3, %v3688_v16, %v989_v12  ;;  %v991_v26 = vpop.permute.xlu0 %990  ;;  %v1747_v25 = vsel %vm1730_vm3, %v1714_v10, %v3785_v40 }
 0x14f   : > { %4587 = vst [vmem:[#allocation6_spill] sm:$0xff] %v3864_v1  ;;  %1450 = vrot.lane.b32.xlu1 %v2575_v2, %s2933_s9  ;;  %v3869_v50 = vsel %vm1730_vm3, %v3693_v0, %v991_v26 }
 0x150   : > { %4588 = vst [vmem:[#allocation7_spill] sm:$0xff] %v3869_v50  ;;  %1482 = vrot.lane.b32.xlu0 %v2591_v34, %s2933_s9  ;;  %v346_v50 = vld [vmem:[%s3029_s10] sm:$0xff] }
 0x151   : > { %v1057_v60 = vpop.permute.xlu1 %1056  ;;  %v1665_v29 = vsel %vm1664_vm1, %v346_v50, %v4591_v21 }
 0x152   : > { %v3873_v44 = vpop.permute.xlu0 %1058 }
 0x153   : > { %1576 = vrot.lane.b32.xlu1 %v2606_v15, %s2934_s29 }
 0x154   : > { %1608 = vrot.lane.b32.xlu0 %v4589_v3, %s2934_s29 }
 0x155   : > { %v3878_v16 = vpop.permute.xlu1 %1060 }
 0x156   : > { %v3880_v52 = vpop.permute.xlu0 %1062 }
 0x157   : > { %1070 = vrot.lane.b32.xlu1 %v2575_v2, %s2930_s6 }
 0x158   : > { %1102 = vrot.lane.b32.xlu0 %v2591_v34, %s2930_s6 }
 0x159   : > { %v3884_v0 = vpop.permute.xlu1 %1064 }
 0x15a   : > { %v3886_v11 = vpop.permute.xlu0 %1066 }
 0x15b   : > { %1196 = vrot.lane.b32.xlu1 %v2606_v15, %s2931_s7  ;;  %v2576_v15 = vld [vmem:[%s3029_s10 + $0x79] sm:$0xff] }
 0x15c   : > { %1228 = vrot.lane.b32.xlu0 %v4589_v3, %s2931_s7 }
 0x15d   : > { %v3892_v33 = vpop.permute.xlu1 %1068 }
 0x15e   : > { %v1089_v27 = vpop.permute.xlu0 %1088 }
 0x15f   : > { %1578 = vrot.lane.b32.xlu1 %v2607_v14, %s2934_s29 }
 0x160   : > { %1610 = vrot.lane.b32.xlu0 %v4590_v53, %s2934_s29 }
 0x161   : > { %v3897_v41 = vpop.permute.xlu1 %1090 }
 0x162   : > { %v1185_v8 = vpop.permute.xlu0 %1184 }
 0x163   : > { %1198 = vrot.lane.b32.xlu1 %v2607_v14, %s2931_s7  ;;  %v2592_v14 = vld [vmem:[%s3029_s10 + $0x139] sm:$0xff] }
 0x164   : > { %1230 = vrot.lane.b32.xlu0 %v4590_v53, %s2931_s7 }
 0x165   : > { %v1217_v2 = vpop.permute.xlu1 %1216 }
 0x166   : > { %v3902_v12 = vpop.permute.xlu0 %1186 }
 0x167   : > { %1324 = vrot.lane.b32.xlu1 %v3346_v46, %s2932_s8 }
 0x168   : > { %1356 = vrot.lane.b32.xlu0 %v3454_v56, %s2932_s8 }
 0x169   : > { %v3908_v34 = vpop.permute.xlu1 %1218 }
 0x16a   : > { %v1313_v26 = vpop.permute.xlu0 %1312 }
 0x16b   : > { %1326 = vrot.lane.b32.xlu1 %v3352_v49, %s2932_s8  ;;  %v2577_v49 = vld [vmem:[%s3029_s10 + $0x81] sm:$0xff] }
 0x16c   : > { %1358 = vrot.lane.b32.xlu0 %v3459_v55, %s2932_s8 }
 0x16d   : > { %v1345_v3 = vpop.permute.xlu1 %1344 }
 0x16e   : > { %v3916_v53 = vpop.permute.xlu0 %1314 }
 0x16f   : > { %1452 = vrot.lane.b32.xlu1 %v2576_v15, %s2933_s9 }
 0x170   : > { %1484 = vrot.lane.b32.xlu0 %v2592_v14, %s2933_s9 }
 0x171   : > { %v3920_v56 = vpop.permute.xlu1 %1346 }
 0x172   : > { %v1441_v46 = vpop.permute.xlu0 %1440 }
 0x173   : > { %1072 = vrot.lane.b32.xlu1 %v2576_v15, %s2930_s6  ;;  %v4594_v15 = vld [vmem:[#allocation35_spill] sm:$0xff] }
 0x174   : > { %1104 = vrot.lane.b32.xlu0 %v2592_v14, %s2930_s6  ;;  %v1698_v57 = vsel %vm1697_vm2, %v1665_v29, %v4594_v15  ;;  %v2608_v14 = vld [vmem:[%s3029_s10 + $0x7a] sm:$0xff]  ;;  %v1780_v15 = vsel %vm1763_vm4, %v1747_v25, %v1089_v27 }
 0x175   : > { %v1473_v55 = vpop.permute.xlu1 %1472  ;;  %v1731_v21 = vsel %vm1730_vm3, %v1698_v57, %v3697_v58  ;;  %v1813_v9 = vsel %vm1796_vm5, %v1780_v15, %v1217_v2  ;;  %v4595_v2 = vld [vmem:[#allocation18_spill] sm:$0xff]  ;;  %v4597_v25 = vld [vmem:[#allocation25_spill] sm:$0xff] }
 0x176   : > { %v3927_v1 = vpop.permute.xlu0 %1092  ;;  %v1764_v38 = vsel %vm1763_vm4, %v1731_v21, %v1057_v60  ;;  %v1846_v10 = vsel %vm1829_vm6, %v1813_v9, %v1345_v3  ;;  %v4596_v3 = vld [vmem:[#allocation36_spill] sm:$0xff] }
 0x177   : > { %1454 = vrot.lane.b32.xlu1 %v2577_v49, %s2933_s9  ;;  %v1797_v30 = vsel %vm1796_vm5, %v1764_v38, %v1185_v8  ;;  %v1879_v60 = vsel %vm1862_vm7, %v1846_v10, %v1473_v55  ;;  %v4598_v38 = vld [vmem:[#allocation29_spill] sm:$0xff] }
 0x178   : > { %1486 = vrot.lane.b32.xlu0 %v2593_v35, %s2933_s9  ;;  %v1830_v58 = vsel %vm1829_vm6, %v1797_v30, %v1313_v26  ;;  %v1666_v26 = vsel %vm1664_vm1, %v347_v7, %v4595_v2  ;;  %v1682_v15 = vsel %vm1664_vm1, %v4598_v38, %v4597_v25  ;;  %v2609_v7 = vld [vmem:[%s3029_s10 + $0x82] sm:$0xff]  ;;  %v2594_v2 = vld [vmem:[%s3029_s10 + $0x151] sm:$0xff] }
 0x179   : > { %v1443_v50 = vpop.permute.xlu1 %1442  ;;  %v1863_v40 = vsel %vm1862_vm7, %v1830_v58, %v1441_v46  ;;  %v1699_v46 = vsel %vm1697_vm2, %v1666_v26, %v4596_v3  ;;  %v4599_v3 = vld [vmem:[#allocation20_spill] sm:$0xff]  ;;  %v4603_v38 = vld [vmem:[#allocation38_spill] sm:$0xff] }
 0x17a   : > { %v1475_v29 = vpop.permute.xlu0 %1474 }
 0x17b   : > { %1580 = vrot.lane.b32.xlu1 %v2608_v14, %s2934_s29 }
 0x17c   : > { %1612 = vrot.lane.b32.xlu0 %v2624_v22, %s2934_s29 }
 0x17d   : > { %v1569_v57 = vpop.permute.xlu1 %1568 }
 0x17e   : > { %v1601_v27 = vpop.permute.xlu0 %1600  ;;  %v1896_v8 = vsel %vm1895_vm8, %v1863_v40, %v1569_v57  ;;  %v2625_v57 = vld [vmem:[%s3029_s10 + $0x142] sm:$0xff] }
 0x17f   : > { %1074 = vrot.lane.b32.xlu1 %v2577_v49, %s2930_s6  ;;  %2720 = vmatprep.mubr.msk.f32.mxu0 %vm1933_vm9, %v1896_v8  ;;  %v1912_v30 = vsel %vm1895_vm8, %v1879_v60, %v1601_v27  ;;  %v1732_v49 = vsel %vm1730_vm3, %v1699_v46, %v3699_v63  ;;  %v2578_v8 = vld [vmem:[%s3029_s10 + $0x91] sm:$0xff]  ;;  %v4600_v46 = vld [vmem:[#allocation22_spill] sm:$0xff] }
 0x180   : > { %1106 = vrot.lane.b32.xlu0 %v2593_v35, %s2930_s6  ;;  %2744 = vmatprep.mubr.msk.f32.mxu1 %vm1933_vm9, %v1912_v30  ;;  %v1765_v9 = vsel %vm1763_vm4, %v1732_v49, %v3873_v44  ;;  %v1715_v35 = vsel %vm1697_vm2, %v1682_v15, %v3587_v19  ;;  %v1667_v49 = vsel %vm1664_vm1, %v4600_v46, %v4599_v3  ;;  %v4607_v3 = vld [vmem:[#allocation27_spill] sm:$0xff] }
 0x181   : > { %v3967_v55 = vpop.permute.xlu1 %1094  ;;  %v1798_v58 = vsel %vm1796_vm5, %v1765_v9, %v3902_v12  ;;  %v1748_v63 = vsel %vm1730_vm3, %v1715_v35, %v3787_v6  ;;  %v1700_v15 = vsel %vm1697_vm2, %v1667_v49, %v4603_v38  ;;  %v2579_v9 = vld [vmem:[%s3029_s10 + $0x99] sm:$0xff]  ;;  %v4608_v46 = vld [vmem:[#allocation31_spill] sm:$0xff] }
 0x182   : > { %v1189_v21 = vpop.permute.xlu0 %1188  ;;  %v1831_v10 = vsel %vm1829_vm6, %v1798_v58, %v3916_v53  ;;  %v1781_v44 = vsel %vm1763_vm4, %v1748_v63, %v3897_v41  ;;  %v1733_v58 = vsel %vm1730_vm3, %v1700_v15, %v3705_v43  ;;  %v2595_v63 = vld [vmem:[%s3029_s10 + $0x159] sm:$0xff]  ;;  %v1684_v49 = vsel %vm1664_vm1, %v4608_v46, %v4607_v3  ;;  %v2628_v3 = vld [vmem:[%s3029_s10 + $0x16a] sm:$0xff] }
 0x183   : > { %1200 = vrot.lane.b32.xlu1 %v2608_v14, %s2931_s7  ;;  %v1864_v14 = vsel %vm1862_vm7, %v1831_v10, %v1443_v50  ;;  %v1814_v12 = vsel %vm1796_vm5, %v1781_v44, %v3908_v34 }
 0x184   : > { %1232 = vrot.lane.b32.xlu0 %v2624_v22, %s2931_s7  ;;  %v1847_v6 = vsel %vm1829_vm6, %v1814_v12, %v3920_v56  ;;  %v2610_v12 = vld [vmem:[%s3029_s10 + $0x92] sm:$0xff] }
 0x185   : > { %v1221_v40 = vpop.permute.xlu1 %1220  ;;  %v1880_v41 = vsel %vm1862_vm7, %v1847_v6, %v1475_v29  ;;  %v2626_v6 = vld [vmem:[%s3029_s10 + $0x152] sm:$0xff] }
 0x186   : > { %v1571_v19 = vpop.permute.xlu0 %1570 }
 0x187   : > { %1582 = vrot.lane.b32.xlu1 %v2609_v7, %s2934_s29  ;;  %v1897_v22 = vsel %vm1895_vm8, %v1864_v14, %v1571_v19 }
 0x188   : > { %1614 = vrot.lane.b32.xlu0 %v2625_v57, %s2934_s29  ;;  %2721 = vmatmul.mubr.msk.f32.vlgmr.msra.gmra.mrb[0].mxu0 %vm1933_vm9, %v1897_v22 }
 0x189   : > { %v1603_v53 = vpop.permute.xlu1 %1602 }
 0x18a   : > { %v1913_v50 = vsel %vm1895_vm8, %v1880_v41, %v1603_v53  ;;  %v1191_v60 = vpop.permute.xlu0 %1190  ;;  %v4604_v53 = vld [vmem:[#allocation21_spill] sm:$0xff] }
 0x18b   : > { %1202 = vrot.lane.b32.xlu1 %v2609_v7, %s2931_s7  ;;  %2745 = vmatmul.mubr.msk.f32.vlgmr.msra.gmra.mrb[0].mxu1 %vm1933_vm9, %v1913_v50  ;;  %v4605_v50 = vld [vmem:[#allocation23_spill] sm:$0xff] }
 0x18c   : > { %1234 = vrot.lane.b32.xlu0 %v2625_v57, %s2931_s7  ;;  %v1766_v57 = vsel %vm1763_vm4, %v1733_v58, %v3878_v16 }
 0x18d   : > { %v4004_v34 = vpop.permute.xlu1 %1222  ;;  %v1799_v19 = vsel %vm1796_vm5, %v1766_v57, %v1189_v21  ;;  %v2548_v57 = vld [vmem:[%s3029_s10 + $0xa8] sm:$0xff] }
 0x18e   : > { %v1317_v56 = vpop.permute.xlu0 %1316 }
 0x18f   : > { %1328 = vrot.lane.b32.xlu1 %v3364_v59, %s2932_s8  ;;  %v1832_v43 = vsel %vm1829_vm6, %v1799_v19, %v1317_v56  ;;  %v1668_v56 = vsel %vm1664_vm1, %v4605_v50, %v4604_v53  ;;  %v2549_v19 = vld [vmem:[%s3029_s10 + $0xb0] sm:$0xff] }
 0x190   : > { %1360 = vrot.lane.b32.xlu0 %v3468_v24, %s2932_s8  ;;  %v2581_v53 = vld [vmem:[%s3029_s10 + $0xb1] sm:$0xff] }
 0x191   : > { %v1349_v29 = vpop.permute.xlu1 %1348 }
 0x192   : > { %v1319_v27 = vpop.permute.xlu0 %1318 }
 0x193   : > { %1330 = vrot.lane.b32.xlu1 %v3369_v62, %s2932_s8  ;;  %v4601_v62 = vld [vmem:[#allocation26_spill] sm:$0xff] }
 0x194   : > { %1362 = vrot.lane.b32.xlu0 %v4562_v61, %s2932_s8  ;;  %v4602_v61 = vld [vmem:[#allocation30_spill] sm:$0xff] }
 0x195   : > { %v1351_v30 = vpop.permute.xlu1 %1350  ;;  %v1683_v25 = vsel %vm1664_vm1, %v4602_v61, %v4601_v62  ;;  %v1717_v61 = vsel %vm1697_vm2, %v1684_v49, %v3595_v20 }
 0x196   : > { %v1445_v26 = vpop.permute.xlu0 %1444  ;;  %v1716_v35 = vsel %vm1697_vm2, %v1683_v25, %v3593_v47 }
 0x197   : > { %1456 = vrot.lane.b32.xlu1 %v2578_v8, %s2933_s9  ;;  %v1749_v10 = vsel %vm1730_vm3, %v1716_v35, %v3793_v31  ;;  %v1865_v22 = vsel %vm1862_vm7, %v1832_v43, %v1445_v26 }
 0x198   : > { %1488 = vrot.lane.b32.xlu0 %v2594_v2, %s2933_s9  ;;  %v1782_v14 = vsel %vm1763_vm4, %v1749_v10, %v3927_v1 }
 0x199   : > { %v1477_v59 = vpop.permute.xlu1 %1476  ;;  %v1815_v47 = vsel %vm1796_vm5, %v1782_v14, %v1221_v40 }
 0x19a   : > { %v4018_v24 = vpop.permute.xlu0 %1096  ;;  %v1848_v31 = vsel %vm1829_vm6, %v1815_v47, %v1349_v29  ;;  %v4606_v29 = vld [vmem:[#allocation40_spill] sm:$0xff] }
 0x19b   : > { %1076 = vrot.lane.b32.xlu1 %v2578_v8, %s2930_s6  ;;  %v1881_v41 = vsel %vm1862_vm7, %v1848_v31, %v1477_v59  ;;  %v1701_v8 = vsel %vm1697_vm2, %v1668_v56, %v4606_v29  ;;  %v2597_v56 = vld [vmem:[%s3029_s10 + $0x171] sm:$0xff] }
 0x19c   : > { %1108 = vrot.lane.b32.xlu0 %v2594_v2, %s2930_s6  ;;  %v1734_v26 = vsel %vm1730_vm3, %v1701_v8, %v3707_v4  ;;  %v1750_v4 = vsel %vm1730_vm3, %v1717_v61, %v3795_v45  ;;  %v2611_v45 = vld [vmem:[%s3029_s10 + $0x9a] sm:$0xff] }
 0x19d   : > { %v1447_v7 = vpop.permute.xlu1 %1446  ;;  %v1767_v62 = vsel %vm1763_vm4, %v1734_v26, %v3880_v52  ;;  %v1783_v52 = vsel %vm1763_vm4, %v1750_v4, %v3967_v55  ;;  %v2612_v26 = vld [vmem:[%s3029_s10 + $0xaa] sm:$0xff] }
 0x19e   : > { %v1479_v44 = vpop.permute.xlu0 %1478  ;;  %v1800_v25 = vsel %vm1796_vm5, %v1767_v62, %v1191_v60  ;;  %v1816_v20 = vsel %vm1796_vm5, %v1783_v52, %v4004_v34  ;;  %v1769_v62 = vsel %vm1763_vm4, %v3721_v18, %v3886_v11 }
 0x19f   : > { %1458 = vrot.lane.b32.xlu1 %v2579_v9, %s2933_s9  ;;  %v1833_v38 = vsel %vm1829_vm6, %v1800_v25, %v1319_v27  ;;  %v1849_v58 = vsel %vm1829_vm6, %v1816_v20, %v1351_v30  ;;  %v2613_v20 = vld [vmem:[%s3029_s10 + $0xb2] sm:$0xff] }
 0x1a0   : > { %1490 = vrot.lane.b32.xlu0 %v2595_v63, %s2933_s9  ;;  %v1882_v55 = vsel %vm1862_vm7, %v1849_v58, %v1479_v44  ;;  %v2629_v58 = vld [vmem:[%s3029_s10 + $0x172] sm:$0xff] }
 0x1a1   : > { %v1573_v16 = vpop.permute.xlu1 %1572 }
 0x1a2   : > { %v1898_v1 = vsel %vm1895_vm8, %v1865_v22, %v1573_v16  ;;  %v1605_v21 = vpop.permute.xlu0 %1604  ;;  %v2596_v22 = vld [vmem:[%s3029_s10 + $0x169] sm:$0xff] }
 0x1a3   : > { %1584 = vrot.lane.b32.xlu1 %v2610_v12, %s2934_s29  ;;  %v1914_v40 = vsel %vm1895_vm8, %v1881_v41, %v1605_v21  ;;  %2723 = vmatprep.mubr.msk.f32.mxu0 %vm1933_vm9, %v1898_v1 }
 0x1a4   : > { %1616 = vrot.lane.b32.xlu0 %v2626_v6, %s2934_s29  ;;  %2747 = vmatprep.mubr.msk.f32.mxu1 %vm1933_vm9, %v1914_v40 }
 0x1a5   : > { %v4063_v2 = vpop.permute.xlu1 %1098 }
 0x1a6   : > { %v1193_v59 = vpop.permute.xlu0 %1192  ;;  %v1785_v25 = vsel %vm1763_vm4, %v3809_v23, %v4063_v2 }
 0x1a7   : > { %1078 = vrot.lane.b32.xlu1 %v2579_v9, %s2930_s6  ;;  %v1866_v9 = vsel %vm1862_vm7, %v1833_v38, %v1447_v7  ;;  %v2627_v7 = vld [vmem:[%s3029_s10 + $0x15a] sm:$0xff] }
 0x1a8   : > { %1110 = vrot.lane.b32.xlu0 %v2595_v63, %s2930_s6 }
 0x1a9   : > { %v1225_v15 = vpop.permute.xlu1 %1224 }
 0x1aa   : > { %v1575_v35 = vpop.permute.xlu0 %1574 }
 0x1ab   : > { %1204 = vrot.lane.b32.xlu1 %v2610_v12, %s2931_s7  ;;  %v1899_v60 = vsel %vm1895_vm8, %v1866_v9, %v1575_v35  ;;  %v2580_v12 = vld [vmem:[%s3029_s10 + $0xa9] sm:$0xff] }
 0x1ac   : > { %1236 = vrot.lane.b32.xlu0 %v2626_v6, %s2931_s7  ;;  %2724 = vmatmul.mubr.msk.f32.gmra.mrb[2].mxu0 %vm1933_vm9, %v1899_v60  ;;  %v1768_v6 = vsel %vm1763_vm4, %v3715_v36, %v3884_v0 }
 0x1ad   : > { %v1607_v27 = vpop.permute.xlu1 %1606  ;;  %v1801_v1 = vsel %vm1796_vm5, %v1768_v6, %v1193_v59 }
 0x1ae   : > { %v1915_v63 = vsel %vm1895_vm8, %v1882_v55, %v1607_v27  ;;  %v1195_v34 = vpop.permute.xlu0 %1194 }
 0x1af   : > { %1586 = vrot.lane.b32.xlu1 %v2611_v45, %s2934_s29  ;;  %2748 = vmatmul.mubr.msk.f32.gmra.mrb[2].mxu1 %vm1933_vm9, %v1915_v63  ;;  %v1802_v4 = vsel %vm1796_vm5, %v1769_v62, %v1195_v34  ;;  %v2566_v34 = vld [vmem:[%s3029_s10 + $0x180] sm:$0xff] }
 0x1b0   : > { %1618 = vrot.lane.b32.xlu0 %v2627_v7, %s2934_s29 }
 0x1b1   : > { %v1227_v30 = vpop.permute.xlu1 %1226 }
 0x1b2   : > { %v1321_v10 = vpop.permute.xlu0 %1320  ;;  %v1818_v38 = vsel %vm1796_vm5, %v1785_v25, %v1227_v30 }
 0x1b3   : > { %1206 = vrot.lane.b32.xlu1 %v2611_v45, %s2931_s7  ;;  %v1834_v40 = vsel %vm1829_vm6, %v1801_v1, %v1321_v10  ;;  %v2551_v10 = vld [vmem:[%s3029_s10 + $0xc8] sm:$0xff] }
 0x1b4   : > { %1238 = vrot.lane.b32.xlu0 %v2627_v7, %s2931_s7  ;;  %v2550_v7 = vld [vmem:[%s3029_s10 + $0xc0] sm:$0xff] }
 0x1b5   : > { %v1353_v44 = vpop.permute.xlu1 %1352 }
 0x1b6   : > { %v1323_v14 = vpop.permute.xlu0 %1322 }
 0x1b7   : > { %1332 = vrot.lane.b32.xlu1 %v2548_v57, %s2932_s8 }
 0x1b8   : > { %1364 = vrot.lane.b32.xlu0 %v4566_v13, %s2932_s8 }
 0x1b9   : > { %v1355_v47 = vpop.permute.xlu1 %1354 }
 0x1ba   : > { %v1449_v43 = vpop.permute.xlu0 %1448  ;;  %v1851_v52 = vsel %vm1829_vm6, %v1818_v38, %v1355_v47 }
 0x1bb   : > { %1334 = vrot.lane.b32.xlu1 %v2549_v19, %s2932_s8  ;;  %v1867_v0 = vsel %vm1862_vm7, %v1834_v40, %v1449_v43  ;;  %v2582_v19 = vld [vmem:[%s3029_s10 + $0xc1] sm:$0xff] }
 0x1bc   : > { %1366 = vrot.lane.b32.xlu0 %v4568_v42, %s2932_s8  ;;  %v1784_v42 = vsel %vm1763_vm4, %v3803_v39, %v4018_v24  ;;  %v2598_v43 = vld [vmem:[%s3029_s10 + $0x181] sm:$0xff] }
 0x1bd   : > { %v1481_v31 = vpop.permute.xlu1 %1480  ;;  %v1817_v21 = vsel %vm1796_vm5, %v1784_v42, %v1225_v15  ;;  %v1835_v15 = vsel %vm1829_vm6, %v1802_v4, %v1323_v14 }
 0x1be   : > { %v4109_v16 = vpop.permute.xlu0 %1100  ;;  %v1850_v36 = vsel %vm1829_vm6, %v1817_v21, %v1353_v44  ;;  %v2567_v44 = vld [vmem:[%s3029_s10 + $0x188] sm:$0xff] }
 0x1bf   : > { %1460 = vrot.lane.b32.xlu1 %v2580_v12, %s2933_s9  ;;  %v1883_v39 = vsel %vm1862_vm7, %v1850_v36, %v1481_v31  ;;  %v1786_v6 = vsel %vm1763_vm4, %v3815_v32, %v4109_v16  ;;  %v2583_v21 = vld [vmem:[%s3029_s10 + $0xc9] sm:$0xff] }
 0x1c0   : > { %1492 = vrot.lane.b32.xlu0 %v2596_v22, %s2933_s9 }
 0x1c1   : > { %v1451_v13 = vpop.permute.xlu1 %1450 }
 0x1c2   : > { %v1483_v41 = vpop.permute.xlu0 %1482  ;;  %v1868_v18 = vsel %vm1862_vm7, %v1835_v15, %v1451_v13  ;;  %v2615_v15 = vld [vmem:[%s3029_s10 + $0xca] sm:$0xff] }
 0x1c3   : > { %1080 = vrot.lane.b32.xlu1 %v2580_v12, %s2930_s6  ;;  %v1884_v9 = vsel %vm1862_vm7, %v1851_v52, %v1483_v41 }
 0x1c4   : > { %1112 = vrot.lane.b32.xlu0 %v2596_v22, %s2930_s6  ;;  %v1770_v22 = vsel %vm1763_vm4, %v3727_v48, %v3892_v33 }
 0x1c5   : > { %v1577_v50 = vpop.permute.xlu1 %1576 }
 0x1c6   : > { %v1900_v24 = vsel %vm1895_vm8, %v1867_v0, %v1577_v50  ;;  %v1609_v29 = vpop.permute.xlu0 %1608  ;;  %v2614_v50 = vld [vmem:[%s3029_s10 + $0xc2] sm:$0xff] }
 0x1c7   : > { %1462 = vrot.lane.b32.xlu1 %v2581_v53, %s2933_s9  ;;  %v1916_v8 = vsel %vm1895_vm8, %v1883_v39, %v1609_v29  ;;  %2726 = vmatprep.mubr.msk.f32.mxu0 %vm1933_vm9, %v1900_v24  ;;  %v2630_v39 = vld [vmem:[%s3029_s10 + $0x182] sm:$0xff] }
 0x1c8   : > { %1494 = vrot.lane.b32.xlu0 %v2597_v56, %s2933_s9  ;;  %2750 = vmatprep.mubr.msk.f32.mxu1 %vm1933_vm9, %v1916_v8 }
 0x1c9   : > { %v4136_v59 = vpop.permute.xlu1 %1070 }
 0x1ca   : > { %v4139_v46 = vpop.permute.xlu0 %1102  ;;  %v1771_v8 = vsel %vm1763_vm4, %v3733_v54, %v4136_v59 }
 0x1cb   : > { %1588 = vrot.lane.b32.xlu1 %v2612_v26, %s2934_s29 }
 0x1cc   : > { %1620 = vrot.lane.b32.xlu0 %v2628_v3, %s2934_s29 }
 0x1cd   : > { %v1197_v49 = vpop.permute.xlu1 %1196 }
 0x1ce   : > { %v1229_v61 = vpop.permute.xlu0 %1228  ;;  %v1803_v41 = vsel %vm1796_vm5, %v1770_v22, %v1197_v49 }
 0x1cf   : > { %1082 = vrot.lane.b32.xlu1 %v2581_v53, %s2930_s6  ;;  %v1819_v42 = vsel %vm1796_vm5, %v1786_v6, %v1229_v61  ;;  %v2599_v53 = vld [vmem:[%s3029_s10 + $0x189] sm:$0xff]  ;;  %v2616_v6 = vld [vmem:[%s3029_s10 + $0xda] sm:$0xff] }
 0x1d0   : > { %1114 = vrot.lane.b32.xlu0 %v2597_v56, %s2930_s6 }
 0x1d1   : > { %v1579_v11 = vpop.permute.xlu1 %1578 }
 0x1d2   : > { %v1901_v23 = vsel %vm1895_vm8, %v1868_v18, %v1579_v11  ;;  %v1611_v2 = vpop.permute.xlu0 %1610  ;;  %v2631_v18 = vld [vmem:[%s3029_s10 + $0x18a] sm:$0xff] }
 0x1d3   : > { %1208 = vrot.lane.b32.xlu1 %v2612_v26, %s2931_s7  ;;  %v1917_v35 = vsel %vm1895_vm8, %v1884_v9, %v1611_v2  ;;  %2727 = vmatmul.mubr.msk.f32.gmra.mrb[4].mxu0 %vm1933_vm9, %v1901_v23  ;;  %v2552_v2 = vld [vmem:[%s3029_s10 + $0xd8] sm:$0xff] }
 0x1d4   : > { %1240 = vrot.lane.b32.xlu0 %v2628_v3, %s2931_s7  ;;  %2751 = vmatmul.mubr.msk.f32.gmra.mrb[4].mxu1 %vm1933_vm9, %v1917_v35  ;;  %v1787_v3 = vsel %vm1763_vm4, %v3821_v51, %v4139_v46 }
 0x1d5   : > { %v1199_v60 = vpop.permute.xlu1 %1198 }
 0x1d6   : > { %v1231_v45 = vpop.permute.xlu0 %1230  ;;  %v1804_v49 = vsel %vm1796_vm5, %v1771_v8, %v1199_v60 }
 0x1d7   : > { %1590 = vrot.lane.b32.xlu1 %v2613_v20, %s2934_s29  ;;  %v1820_v62 = vsel %vm1796_vm5, %v1787_v3, %v1231_v45 }
 0x1d8   : > { %1622 = vrot.lane.b32.xlu0 %v2629_v58, %s2934_s29 }
 0x1d9   : > { %v1325_v55 = vpop.permute.xlu1 %1324 }
 0x1da   : > { %v1357_v27 = vpop.permute.xlu0 %1356  ;;  %v1836_v1 = vsel %vm1829_vm6, %v1803_v41, %v1325_v55  ;;  %v2569_v55 = vld [vmem:[%s3029_s10 + $0x1a0] sm:$0xff] }
 0x1db   : > { %1210 = vrot.lane.b32.xlu1 %v2613_v20, %s2931_s7  ;;  %v1852_v48 = vsel %vm1829_vm6, %v1819_v42, %v1357_v27  ;;  %v2568_v20 = vld [vmem:[%s3029_s10 + $0x198] sm:$0xff] }
 0x1dc   : > { %1242 = vrot.lane.b32.xlu0 %v2629_v58, %s2931_s7  ;;  %v2553_v58 = vld [vmem:[%s3029_s10 + $0xe0] sm:$0xff] }
 0x1dd   : > { %v1327_v63 = vpop.permute.xlu1 %1326  ;;  %v2632_v42 = vld [vmem:[%s3029_s10 + $0x19a] sm:$0xff] }
 0x1de   : > { %v1359_v30 = vpop.permute.xlu0 %1358  ;;  %v1837_v61 = vsel %vm1829_vm6, %v1804_v49, %v1327_v63 }
 0x1df   : > { %1336 = vrot.lane.b32.xlu1 %v2550_v7, %s2932_s8  ;;  %v1853_v25 = vsel %vm1829_vm6, %v1820_v62, %v1359_v30  ;;  %v2584_v7 = vld [vmem:[%s3029_s10 + $0xd9] sm:$0xff] }
 0x1e0   : > { %1368 = vrot.lane.b32.xlu0 %v2566_v34, %s2932_s8  ;;  %v2600_v34 = vld [vmem:[%s3029_s10 + $0x199] sm:$0xff] }
 0x1e1   : > { %v1453_v57 = vpop.permute.xlu1 %1452 }
 0x1e2   : > { %v1485_v14 = vpop.permute.xlu0 %1484  ;;  %v1869_v33 = vsel %vm1862_vm7, %v1836_v1, %v1453_v57 }
 0x1e3   : > { %1338 = vrot.lane.b32.xlu1 %v2551_v10, %s2932_s8  ;;  %v1885_v32 = vsel %vm1862_vm7, %v1852_v48, %v1485_v14  ;;  %v2585_v10 = vld [vmem:[%s3029_s10 + $0xe1] sm:$0xff] }
 0x1e4   : > { %1370 = vrot.lane.b32.xlu0 %v2567_v44, %s2932_s8  ;;  %v2601_v44 = vld [vmem:[%s3029_s10 + $0x1a1] sm:$0xff] }
 0x1e5   : > { %v4178_v47 = vpop.permute.xlu1 %1072  ;;  %v2617_v48 = vld [vmem:[%s3029_s10 + $0xe2] sm:$0xff] }
 0x1e6   : > { %v4181_v12 = vpop.permute.xlu0 %1104  ;;  %v1772_v14 = vsel %vm1763_vm4, %v3739_v28, %v4178_v47 }
 0x1e7   : > { %1464 = vrot.lane.b32.xlu1 %v2582_v19, %s2933_s9 }
 0x1e8   : > { %1496 = vrot.lane.b32.xlu0 %v2598_v43, %s2933_s9 }
 0x1e9   : > { %v1455_v31 = vpop.permute.xlu1 %1454 }
 0x1ea   : > { %v1487_v13 = vpop.permute.xlu0 %1486  ;;  %v1870_v54 = vsel %vm1862_vm7, %v1837_v61, %v1455_v31 }
 0x1eb   : > { %1084 = vrot.lane.b32.xlu1 %v2582_v19, %s2930_s6  ;;  %v1886_v4 = vsel %vm1862_vm7, %v1853_v25, %v1487_v13 }
 0x1ec   : > { %1116 = vrot.lane.b32.xlu0 %v2598_v43, %s2930_s6  ;;  %v1788_v43 = vsel %vm1763_vm4, %v3827_v5, %v4181_v12 }
 0x1ed   : > { %v1581_v40 = vpop.permute.xlu1 %1580 }
 0x1ee   : > { %v1902_v16 = vsel %vm1895_vm8, %v1869_v33, %v1581_v40  ;;  %v1613_v36 = vpop.permute.xlu0 %1612  ;;  %v2633_v40 = vld [vmem:[%s3029_s10 + $0x1a2] sm:$0xff]  ;;  %s254_s10 = sand.u32 1, %s2909_s16  }
 0x1ef   : > { %1466 = vrot.lane.b32.xlu1 %v2583_v21, %s2933_s9  ;;  %v1918_v0 = vsel %vm1895_vm8, %v1885_v32, %v1613_v36  ;;  %2729 = vmatprep.mubr.msk.f32.mxu0 %vm1933_vm9, %v1902_v16  ;;  %s2438_s11 = sshll.u32 %s254_s10, 8  ;;  %s4435_s18 = scalar_lea.sflag [#allocation4], %s254_s10 }
 0x1f0   : > { %1498 = vrot.lane.b32.xlu0 %v2599_v53, %s2933_s9  ;;  %2753 = vmatprep.mubr.msk.f32.mxu1 %vm1933_vm9, %v1918_v0  ;;  %s4334_s13 = scalar_lea.vmem [#allocation3], %s2438_s11 }
 0x1f1   : > { %v4208_v56 = vpop.permute.xlu1 %1074  ;;  %s2309_s21 = sshll.u32 %s4334_s13, 4  ;;  %s4428_s21 = int_to_ptr.vmem [resolvable:$true] %s2309_s21 }
 0x1f2   : > { %v4211_v24 = vpop.permute.xlu0 %1106  ;;  %v1773_v16 = vsel %vm1763_vm4, %v3745_v37, %v4208_v56  ;;  %s2847_s5 = scalar_lea.vmem %s4428_s21, 4096 }
 0x1f3   : > { %1592 = vrot.lane.b32.xlu1 %v2614_v50, %s2934_s29  ;;  %v1789_v0 = vsel %vm1763_vm4, %v3833_v17, %v4211_v24  ;;  %p2848_p12 = scmp.ne.s32.totalorder %s4428_s21, %s2847_s5 }
 0x1f4   : > { %1624 = vrot.lane.b32.xlu0 %v2630_v39, %s2934_s29 }
 0x1f5   : > { %v1201_v29 = vpop.permute.xlu1 %1200  ;;  %p2849_p13 = pnand %p2848_p12, %p3002_p4 }
 0x1f6   : > { %v1233_v26 = vpop.permute.xlu0 %1232  ;;  %v1805_v31 = vsel %vm1796_vm5, %v1772_v14, %v1201_v29 }
 0x1f7   : > { %1086 = vrot.lane.b32.xlu1 %v2583_v21, %s2930_s6  ;;  %v1821_v22 = vsel %vm1796_vm5, %v1788_v43, %v1233_v26  ;;  %p2850_p0 = pneg %p2849_p13 }
 0x1f8   : > { %1118 = vrot.lane.b32.xlu0 %v2599_v53, %s2930_s6  ;;  %s2851_s6 = sshll.u32 %s2935_s24, 4  ;;  %s2852_s6 = int_to_ptr.vmem [resolvable:$false] %s2851_s6 }
 0x1f9   : > { %v1583_v59 = vpop.permute.xlu1 %1582  ;;  %p2854_p1 = scmp.lt.s32.totalorder %s4428_s21, %s2852_s6 }
 0x1fa   : > { %v1903_v51 = vsel %vm1895_vm8, %v1870_v54, %v1583_v59  ;;  %v1615_v46 = vpop.permute.xlu0 %1614 }
 0x1fb   : > { %1212 = vrot.lane.b32.xlu1 %v2614_v50, %s2931_s7  ;;  %v1919_v38 = vsel %vm1895_vm8, %v1886_v4, %v1615_v46  ;;  %2730 = vmatmul.mubr.msk.f32.gmra.mrb[6].mxu0 %vm1933_vm9, %v1903_v51 }
 0x1fc   : > { %1244 = vrot.lane.b32.xlu0 %v2630_v39, %s2931_s7  ;;  %2754 = vmatmul.mubr.msk.f32.gmra.mrb[6].mxu1 %vm1933_vm9, %v1919_v38 }
 0x1fd   : > { %v1203_v52 = vpop.permute.xlu1 %1202 }
 0x1fe   : > { %v1235_v11 = vpop.permute.xlu0 %1234  ;;  %v1806_v50 = vsel %vm1796_vm5, %v1773_v16, %v1203_v52  ;;  %v4609_v52 = vld [vmem:[#allocation32_spill] sm:$0xff] }
 0x1ff   : > { %1594 = vrot.lane.b32.xlu1 %v2615_v15, %s2934_s29  ;;  %v1822_v39 = vsel %vm1796_vm5, %v1789_v0, %v1235_v11 }
 0x200   : > { %1626 = vrot.lane.b32.xlu0 %v2631_v18, %s2934_s29 }
 0x201   : > { %v1329_v9 = vpop.permute.xlu1 %1328 }
 0x202   : > { %v1361_v23 = vpop.permute.xlu0 %1360  ;;  %v1838_v13 = vsel %vm1829_vm6, %v1805_v31, %v1329_v9  ;;  %v4610_v9 = vld [vmem:[#allocation34_spill] sm:$0xff] }
 0x203   : > { %1214 = vrot.lane.b32.xlu1 %v2615_v15, %s2931_s7  ;;  %v1854_v28 = vsel %vm1829_vm6, %v1821_v22, %v1361_v23 }
 0x204   : > { %1246 = vrot.lane.b32.xlu0 %v2631_v18, %s2931_s7  ;;  %s2853_s7 = scalar_lea.vmem %s2852_s6, 8192 }
 0x205   : > { %v1331_v35 = vpop.permute.xlu1 %1330  ;;  %p2855_p2 = scmp.lt.s32.totalorder %s2853_s7, %s2847_s5 }
 0x206   : > { %v1363_v60 = vpop.permute.xlu0 %1362  ;;  %v1839_v29 = vsel %vm1829_vm6, %v1806_v50, %v1331_v35 }
 0x207   : > { %1340 = vrot.lane.b32.xlu1 %v2552_v2, %s2932_s8  ;;  %v1855_v8 = vsel %vm1829_vm6, %v1822_v39, %v1363_v60  ;;  %p2856_p3 = por %p2855_p2, %p2854_p1 }
 0x208   : > { %1372 = vrot.lane.b32.xlu0 %v2568_v20, %s2932_s8 }
 0x209   : > { %v1457_v45 = vpop.permute.xlu1 %1456  ;;  %p2857_p5 = pnand %p2856_p3, %p2850_p0 }
 0x20a   : > { %v1489_v27 = vpop.permute.xlu0 %1488  ;;  %v1871_v47 = vsel %vm1862_vm7, %v1838_v13, %v1457_v45 }
 0x20b   : > { %1342 = vrot.lane.b32.xlu1 %v2553_v58, %s2932_s8  ;;  %v1887_v5 = vsel %vm1862_vm7, %v1854_v28, %v1489_v27 }
 0x20c   : > { %1374 = vrot.lane.b32.xlu0 %v2569_v55, %s2932_s8 }
 0x20d   : > { %v4250_v63 = vpop.permute.xlu1 %1076 }
 0x20e   : > { %v4253_v30 = vpop.permute.xlu0 %1108  ;;  %v1774_v18 = vsel %vm1763_vm4, %v4609_v52, %v4250_v63 }
 0x20f   : > { %1468 = vrot.lane.b32.xlu1 %v2584_v7, %s2933_s9  ;;  %v1790_v23 = vsel %vm1763_vm4, %v4610_v9, %v4253_v30 }
 0x210   : > { %1500 = vrot.lane.b32.xlu0 %v2600_v34, %s2933_s9 }
 0x211   : > { %v1459_v57 = vpop.permute.xlu1 %1458 }
 0x212   : > { %v1491_v19 = vpop.permute.xlu0 %1490  ;;  %v1872_v26 = vsel %vm1862_vm7, %v1839_v29, %v1459_v57  ;;  %v4611_v57 = vld [vmem:[#allocation37_spill] sm:$0xff] }
 0x213   : > { %1470 = vrot.lane.b32.xlu1 %v2585_v10, %s2933_s9  ;;  %v1888_v49 = vsel %vm1862_vm7, %v1855_v8, %v1491_v19  ;;  %v4612_v19 = vld [vmem:[#allocation41_spill] sm:$0xff] }
 0x214   : > { %1502 = vrot.lane.b32.xlu0 %v2601_v44, %s2933_s9 }
 0x215   : > { %v1585_v41 = vpop.permute.xlu1 %1584 }
 0x216   : > { %v1904_v12 = vsel %vm1895_vm8, %v1871_v47, %v1585_v41  ;;  %v1617_v1 = vpop.permute.xlu0 %1616 }
 0x217   : > { %1596 = vrot.lane.b32.xlu1 %v2616_v6, %s2934_s29  ;;  %v1920_v21 = vsel %vm1895_vm8, %v1887_v5, %v1617_v1  ;;  %2732 = vmatprep.mubr.msk.f32.mxu0 %vm1933_vm9, %v1904_v12 }
 0x218   : > { %1628 = vrot.lane.b32.xlu0 %v2632_v42, %s2934_s29  ;;  %2756 = vmatprep.mubr.msk.f32.mxu1 %vm1933_vm9, %v1920_v21 }
 0x219   : > { %v1079_v33 = vpop.permute.xlu1 %1078 }
 0x21a   : > { %v1111_v53 = vpop.permute.xlu0 %1110  ;;  %v1775_v44 = vsel %vm1763_vm4, %v4611_v57, %v1079_v33 }
 0x21b   : > { %1598 = vrot.lane.b32.xlu1 %v2617_v48, %s2934_s29  ;;  %v1791_v43 = vsel %vm1763_vm4, %v4612_v19, %v1111_v53 }
 0x21c   : > { %1630 = vrot.lane.b32.xlu0 %v2633_v40, %s2934_s29 }
 0x21d   : > { %v1205_v32 = vpop.permute.xlu1 %1204 }
 0x21e   : > { %v1237_v36 = vpop.permute.xlu0 %1236  ;;  %v1807_v2 = vsel %vm1796_vm5, %v1774_v18, %v1205_v32 }
 0x21f   : > { %v1823_v35 = vsel %vm1796_vm5, %v1790_v23, %v1237_v36 }
 0x221   : > { %v1587_v3 = vpop.permute.xlu1 %1586 }
 0x222   : > { %v1905_v37 = vsel %vm1895_vm8, %v1872_v26, %v1587_v3  ;;  %v1619_v56 = vpop.permute.xlu0 %1618  ;;  %v4613_v3 = vld [vmem:[#allocation8_spill] sm:$0xff] }
 0x223   : > { %v1921_v62 = vsel %vm1895_vm8, %v1888_v49, %v1619_v56  ;;  %2733 = vmatmul.mubr.msk.f32.gmra.mrb[8].mxu0 %vm1933_vm9, %v1905_v37  ;;  %v4614_v56 = vld [vmem:[#allocation9_spill] sm:$0xff] }
 0x224   : > { %2757 = vmatmul.mubr.msk.f32.gmra.mrb[8].mxu1 %vm1933_vm9, %v1921_v62 }
 0x225   : > { %v1207_v17 = vpop.permute.xlu1 %1206 }
 0x226   : > { %v1239_v24 = vpop.permute.xlu0 %1238  ;;  %v1808_v31 = vsel %vm1796_vm5, %v1775_v44, %v1207_v17 }
 0x227   : > { %v1824_v22 = vsel %vm1796_vm5, %v1791_v43, %v1239_v24 }
 0x229   : > { %v1333_v61 = vpop.permute.xlu1 %1332 }
 0x22a   : > { %v1365_v25 = vpop.permute.xlu0 %1364  ;;  %v1840_v20 = vsel %vm1829_vm6, %v1807_v2, %v1333_v61  ;;  %v4616_v2 = vld [vmem:[#allocation13_spill] sm:$0xff] }
 0x22b   : > { %v1856_v60 = vsel %vm1829_vm6, %v1823_v35, %v1365_v25 }
 0x22d   : > { %v1335_v54 = vpop.permute.xlu1 %1334 }
 0x22e   : > { %v1367_v59 = vpop.permute.xlu0 %1366  ;;  %v1841_v13 = vsel %vm1829_vm6, %v1808_v31, %v1335_v54 }
 0x22f   : > { %v1857_v6 = vsel %vm1829_vm6, %v1824_v22, %v1367_v59 }
 0x231   : > { %v1461_v4 = vpop.permute.xlu1 %1460 }
 0x232   : > { %v1493_v51 = vpop.permute.xlu0 %1492  ;;  %v1873_v58 = vsel %vm1862_vm7, %v1840_v20, %v1461_v4 }
 0x233   : > { %v1889_v55 = vsel %vm1862_vm7, %v1856_v60, %v1493_v51 }
 0x235   : > { %v1081_v46 = vpop.permute.xlu1 %1080 }
 0x236   : > { %v1113_v38 = vpop.permute.xlu0 %1112  ;;  %v1776_v49 = vsel %vm1763_vm4, %v4613_v3, %v1081_v46 }
 0x237   : > { %v1792_v62 = vsel %vm1763_vm4, %v4614_v56, %v1113_v38 }
 0x239   : > { %v1463_v15 = vpop.permute.xlu1 %1462 }
 0x23a   : > { %v1495_v11 = vpop.permute.xlu0 %1494  ;;  %v1874_v28 = vsel %vm1862_vm7, %v1841_v13, %v1463_v15 }
 0x23b   : > { %v1890_v41 = vsel %vm1862_vm7, %v1857_v6, %v1495_v11  ;;  %v4615_v11 = vld [vmem:[#allocation12_spill] sm:$0xff] }
 0x23d   : > { %v1589_v45 = vpop.permute.xlu1 %1588 }
 0x23e   : > { %v1906_v27 = vsel %vm1895_vm8, %v1873_v58, %v1589_v45  ;;  %v1621_v7 = vpop.permute.xlu0 %1620 }
 0x23f   : > { %v1922_v63 = vsel %vm1895_vm8, %v1889_v55, %v1621_v7  ;;  %2735 = vmatprep.mubr.msk.f32.mxu0 %vm1933_vm9, %v1906_v27 }
 0x240   : > { %2759 = vmatprep.mubr.msk.f32.mxu1 %vm1933_vm9, %v1922_v63 }
 0x241   : > { %v1083_v34 = vpop.permute.xlu1 %1082 }
 0x242   : > { %v1115_v30 = vpop.permute.xlu0 %1114  ;;  %v1777_v9 = vsel %vm1763_vm4, %v4615_v11, %v1083_v34 }
 0x243   : > { %v1793_v35 = vsel %vm1763_vm4, %v4616_v2, %v1115_v30 }
 0x245   : > { %v1209_v10 = vpop.permute.xlu1 %1208 }
 0x246   : > { %v1241_v14 = vpop.permute.xlu0 %1240  ;;  %v1809_v17 = vsel %vm1796_vm5, %v1776_v49, %v1209_v10 }
 0x247   : > { %v1825_v24 = vsel %vm1796_vm5, %v1792_v62, %v1241_v14 }
 0x249   : > { %v1591_v47 = vpop.permute.xlu1 %1590 }
 0x24a   : > { %v1907_v42 = vsel %vm1895_vm8, %v1874_v28, %v1591_v47  ;;  %v1623_v5 = vpop.permute.xlu0 %1622 }
 0x24b   : > { %v1923_v12 = vsel %vm1895_vm8, %v1890_v41, %v1623_v5  ;;  %2736 = vmatmul.mubr.msk.f32.gmra.mrb[10].mxu0 %vm1933_vm9, %v1907_v42  ;;  %v4617_v42 = vld [vmem:[#allocation33_spill] sm:$0xff] }
 0x24c   : > { %2760 = vmatmul.mubr.msk.f32.gmra.mrb[10].mxu1 %vm1933_vm9, %v1923_v12 }
 0x24d   : > { %v1211_v1 = vpop.permute.xlu1 %1210 }
 0x24e   : > { %v1243_v21 = vpop.permute.xlu0 %1242  ;;  %v1810_v20 = vsel %vm1796_vm5, %v1777_v9, %v1211_v1  ;;  %v4618_v1 = vld [vmem:[#allocation6_spill] sm:$0xff] }
 0x24f   : > { %v1826_v60 = vsel %vm1796_vm5, %v1793_v35, %v1243_v21 }
 0x251   : > { %v1337_v48 = vpop.permute.xlu1 %1336 }
 0x252   : > { %v1369_v33 = vpop.permute.xlu0 %1368  ;;  %v1842_v61 = vsel %vm1829_vm6, %v1809_v17, %v1337_v48 }
 0x253   : > { %v1858_v25 = vsel %vm1829_vm6, %v1825_v24, %v1369_v33 }
 0x255   : > { %v1339_v40 = vpop.permute.xlu1 %1338 }
 0x256   : > { %v1371_v53 = vpop.permute.xlu0 %1370  ;;  %v1843_v58 = vsel %vm1829_vm6, %v1810_v20, %v1339_v40 }
 0x257   : > { %v1859_v45 = vsel %vm1829_vm6, %v1826_v60, %v1371_v53 }
 0x259   : > { %v1465_v32 = vpop.permute.xlu1 %1464 }
 0x25a   : > { %v1497_v16 = vpop.permute.xlu0 %1496  ;;  %v1875_v54 = vsel %vm1862_vm7, %v1842_v61, %v1465_v32 }
 0x25b   : > { %v2722_v36 = vpop.f32.mrb[0].mxu0  ;;  %v1891_v4 = vsel %vm1862_vm7, %v1858_v25, %v1497_v16 }
 0x25c   : > { %2260 = vst [vmem:[%s4334_s13 + $0x8] sm:$0xff] %v2722_v36  ;;  %v2100_v0 = vpop.f32.mrb[1].mxu0  ;;  %v4619_v36 = vld [vmem:[#allocation39_spill] sm:$0xff] }
 0x25d   : > { %v1085_v50 = vpop.permute.xlu1 %1084  ;;  %2259 = vst [vmem:[%s4334_s13] sm:$0xff] %v2100_v0 }
 0x25e   : > { %v2746_v39 = vpop.f32.mrb[0].mxu1  ;;  %v1117_v29 = vpop.permute.xlu0 %1116  ;;  %v1778_v5 = vsel %vm1763_vm4, %v4617_v42, %v1085_v50 }
 0x25f   : > { %2276 = vst [vmem:[%s4334_s13 + $0x88] sm:$0xff] %v2746_v39  ;;  %v2180_v8 = vpop.f32.mrb[1].mxu1  ;;  %v1794_v21 = vsel %vm1763_vm4, %v4618_v1, %v1117_v29  ;;  %v4620_v29 = vld [vmem:[#allocation7_spill] sm:$0xff] }
 0x260   : > { %2275 = vst [vmem:[%s4334_s13 + $0x80] sm:$0xff] %v2180_v8 }
 0x261   : > { %v1467_v26 = vpop.permute.xlu1 %1466 }
 0x262   : > { %v1499_v37 = vpop.permute.xlu0 %1498  ;;  %v1876_v55 = vsel %vm1862_vm7, %v1843_v58, %v1467_v26 }
 0x263   : > { %v1892_v7 = vsel %vm1862_vm7, %v1859_v45, %v1499_v37 }
 0x265   : > { %v1593_v59 = vpop.permute.xlu1 %1592 }
 0x266   : > { %v1908_v51 = vsel %vm1895_vm8, %v1875_v54, %v1593_v59  ;;  %v1625_v46 = vpop.permute.xlu0 %1624 }
 0x267   : > { %v1924_v15 = vsel %vm1895_vm8, %v1891_v4, %v1625_v46  ;;  %2738 = vmatprep.mubr.msk.f32.mxu0 %vm1933_vm9, %v1908_v51 }
 0x268   : > { %2762 = vmatprep.mubr.msk.f32.mxu1 %vm1933_vm9, %v1924_v15 }
 0x269   : > { %v1087_v38 = vpop.permute.xlu1 %1086 }
 0x26a   : > { %v1119_v52 = vpop.permute.xlu0 %1118  ;;  %v1779_v0 = vsel %vm1763_vm4, %v4619_v36, %v1087_v38 }
 0x26b   : > { %v1795_v26 = vsel %vm1763_vm4, %v4620_v29, %v1119_v52 }
 0x26d   : > { %v1213_v18 = vpop.permute.xlu1 %1212 }
 0x26e   : > { %v1245_v23 = vpop.permute.xlu0 %1244  ;;  %v1811_v48 = vsel %vm1796_vm5, %v1778_v5, %v1213_v18 }
 0x26f   : > { %v1827_v33 = vsel %vm1796_vm5, %v1794_v21, %v1245_v23 }
 0x271   : > { %v1595_v27 = vpop.permute.xlu1 %1594 }
 0x272   : > { %v1909_v63 = vsel %vm1895_vm8, %v1876_v55, %v1595_v27  ;;  %v1627_v34 = vpop.permute.xlu0 %1626 }
 0x273   : > { %v1925_v30 = vsel %vm1895_vm8, %v1892_v7, %v1627_v34  ;;  %2739 = vmatmul.mubr.msk.f32.gmra.mrb[12].mxu0 %vm1933_vm9, %v1909_v63 }
 0x274   : > { %2763 = vmatmul.mubr.msk.f32.gmra.mrb[12].mxu1 %vm1933_vm9, %v1925_v30 }
 0x275   : > { %v1215_v10 = vpop.permute.xlu1 %1214 }
 0x276   : > { %v1247_v57 = vpop.permute.xlu0 %1246  ;;  %v1812_v3 = vsel %vm1796_vm5, %v1779_v0, %v1215_v10 }
 0x277   : > { %v1828_v37 = vsel %vm1796_vm5, %v1795_v26, %v1247_v57 }
 0x279   : > { %v1341_v44 = vpop.permute.xlu1 %1340 }
 0x27a   : > { %v1373_v14 = vpop.permute.xlu0 %1372  ;;  %v1844_v40 = vsel %vm1829_vm6, %v1811_v48, %v1341_v44 }
 0x27b   : > { %v1860_v53 = vsel %vm1829_vm6, %v1827_v33, %v1373_v14 }
 0x27d   : > { %v1343_v19 = vpop.permute.xlu1 %1342 }
 0x27e   : > { %v1375_v43 = vpop.permute.xlu0 %1374  ;;  %v1845_v56 = vsel %vm1829_vm6, %v1812_v3, %v1343_v19 }
 0x27f   : > { %v2725_v31 = vpop.f32.mrb[2].mxu0  ;;  %v1861_v62 = vsel %vm1829_vm6, %v1828_v37, %v1375_v43 }
 0x280   : > { %2262 = vst [vmem:[%s4334_s13 + $0x18] sm:$0xff] %v2725_v31  ;;  %v2110_v22 = vpop.f32.mrb[3].mxu0 }
 0x281   : > { %v1469_v13 = vpop.permute.xlu1 %1468  ;;  %2261 = vst [vmem:[%s4334_s13 + $0x10] sm:$0xff] %v2110_v22 }
 0x282   : > { %v2749_v6 = vpop.f32.mrb[2].mxu1  ;;  %v1501_v28 = vpop.permute.xlu0 %1500  ;;  %v1877_v32 = vsel %vm1862_vm7, %v1844_v40, %v1469_v13 }
 0x283   : > { %2278 = vst [vmem:[%s4334_s13 + $0x98] sm:$0xff] %v2749_v6  ;;  %v2190_v47 = vpop.f32.mrb[3].mxu1  ;;  %v1893_v50 = vsel %vm1862_vm7, %v1860_v53, %v1501_v28 }
 0x284   : > { %2277 = vst [vmem:[%s4334_s13 + $0x90] sm:$0xff] %v2190_v47 }
 0x285   : > { %v1471_v41 = vpop.permute.xlu1 %1470 }
 0x286   : > { %v1503_v12 = vpop.permute.xlu0 %1502  ;;  %v1878_v17 = vsel %vm1862_vm7, %v1845_v56, %v1471_v41 }
 0x287   : > { %v1894_v61 = vsel %vm1862_vm7, %v1861_v62, %v1503_v12 }
 0x289   : > { %v1597_v16 = vpop.permute.xlu1 %1596 }
 0x28a   : > { %v1910_v39 = vsel %vm1895_vm8, %v1877_v32, %v1597_v16  ;;  %v1629_v8 = vpop.permute.xlu0 %1628 }
 0x28b   : > { %v1926_v49 = vsel %vm1895_vm8, %v1893_v50, %v1629_v8  ;;  %2741 = vmatprep.mubr.msk.f32.mxu0 %vm1933_vm9, %v1910_v39 }
 0x28c   : > { %2765 = vmatprep.mubr.msk.f32.mxu1 %vm1933_vm9, %v1926_v49 }
 0x28d   : > { %v1599_v24 = vpop.permute.xlu1 %1598 }
 0x28e   : > { %v1911_v25 = vsel %vm1895_vm8, %v1878_v17, %v1599_v24  ;;  %v1631_v54 = vpop.permute.xlu0 %1630 }
 0x28f   : > { %v1927_v59 = vsel %vm1895_vm8, %v1894_v61, %v1631_v54  ;;  %2742 = vmatmul.mubr.msk.f32.gmra.mrb[14].mxu0 %vm1933_vm9, %v1911_v25 }
 0x290   : > { %2766 = vmatmul.mubr.msk.f32.gmra.mrb[14].mxu1 %vm1933_vm9, %v1927_v59 }
 0x2a6   : > { %v2728_v4 = vpop.f32.mrb[4].mxu0 }
 0x2a7   : > { %2264 = vst [vmem:[%s4334_s13 + $0x28] sm:$0xff] %v2728_v4  ;;  %v2120_v51 = vpop.f32.mrb[5].mxu0  ;;  %v2752_v46 = vpop.f32.mrb[4].mxu1 }
 0x2a8   : > { %2263 = vst [vmem:[%s4334_s13 + $0x20] sm:$0xff] %v2120_v51  ;;  %2280 = vst [vmem:[%s4334_s13 + $0xa8] sm:$0xff] %v2752_v46  ;;  %v2200_v15 = vpop.f32.mrb[5].mxu1 }
 0x2a9   : > { %2279 = vst [vmem:[%s4334_s13 + $0xa0] sm:$0xff] %v2200_v15 }
 0x2ce   : > { %v2731_v38 = vpop.f32.mrb[6].mxu0 }
 0x2cf   : > { %2266 = vst [vmem:[%s4334_s13 + $0x38] sm:$0xff] %v2731_v38  ;;  %v2130_v52 = vpop.f32.mrb[7].mxu0  ;;  %v2755_v18 = vpop.f32.mrb[6].mxu1 }
 0x2d0   : > { %2265 = vst [vmem:[%s4334_s13 + $0x30] sm:$0xff] %v2130_v52  ;;  %2282 = vst [vmem:[%s4334_s13 + $0xb8] sm:$0xff] %v2755_v18  ;;  %v2210_v11 = vpop.f32.mrb[7].mxu1 }
 0x2d1   : > { %2281 = vst [vmem:[%s4334_s13 + $0xb0] sm:$0xff] %v2210_v11 }
 0x2f6   : > { %v2734_v9 = vpop.f32.mrb[8].mxu0 }
 0x2f7   : > { %2268 = vst [vmem:[%s4334_s13 + $0x48] sm:$0xff] %v2734_v9  ;;  %v2140_v23 = vpop.f32.mrb[9].mxu0  ;;  %v2758_v2 = vpop.f32.mrb[8].mxu1 }
 0x2f8   : > { %2267 = vst [vmem:[%s4334_s13 + $0x40] sm:$0xff] %v2140_v23  ;;  %2284 = vst [vmem:[%s4334_s13 + $0xc8] sm:$0xff] %v2758_v2  ;;  %v2220_v35 = vpop.f32.mrb[9].mxu1 }
 0x2f9   : > { %2283 = vst [vmem:[%s4334_s13 + $0xc0] sm:$0xff] %v2220_v35 }
 0x31e   : > { %v2737_v20 = vpop.f32.mrb[10].mxu0 }
 0x31f   : > { %2270 = vst [vmem:[%s4334_s13 + $0x58] sm:$0xff] %v2737_v20  ;;  %v2150_v60 = vpop.f32.mrb[11].mxu0  ;;  %v2761_v58 = vpop.f32.mrb[10].mxu1 }
 0x320   : > { %2269 = vst [vmem:[%s4334_s13 + $0x50] sm:$0xff] %v2150_v60  ;;  %2286 = vst [vmem:[%s4334_s13 + $0xd8] sm:$0xff] %v2761_v58  ;;  %v2230_v45 = vpop.f32.mrb[11].mxu1 }
 0x321   : > { %2285 = vst [vmem:[%s4334_s13 + $0xd0] sm:$0xff] %v2230_v45 }
 0x346   : > { %v2740_v55 = vpop.f32.mrb[12].mxu0 }
 0x347   : > { %2272 = vst [vmem:[%s4334_s13 + $0x68] sm:$0xff] %v2740_v55  ;;  %v2160_v27 = vpop.f32.mrb[13].mxu0  ;;  %v2764_v7 = vpop.f32.mrb[12].mxu1 }
 0x348   : > { %2271 = vst [vmem:[%s4334_s13 + $0x60] sm:$0xff] %v2160_v27  ;;  %2288 = vst [vmem:[%s4334_s13 + $0xe8] sm:$0xff] %v2764_v7  ;;  %v2240_v63 = vpop.f32.mrb[13].mxu1 }
 0x349   : > { %2287 = vst [vmem:[%s4334_s13 + $0xe0] sm:$0xff] %v2240_v63 }
 0x362   : > { %v2743_v34 = vpop.f32.mrb[14].mxu0 }
 0x363   : > { %2274 = vst [vmem:[%s4334_s13 + $0x78] sm:$0xff] %v2743_v34  ;;  %v2170_v30 = vpop.f32.mrb[15].mxu0  ;;  %v2767_v10 = vpop.f32.mrb[14].mxu1 }
 0x364   : > { %2273 = vst [vmem:[%s4334_s13 + $0x70] sm:$0xff] %v2170_v30  ;;  %2290 = vst [vmem:[%s4334_s13 + $0xf8] sm:$0xff] %v2767_v10  ;;  %v2250_v57 = vpop.f32.mrb[15].mxu1 }
 0x365   : > { %2289 = vst [vmem:[%s4334_s13 + $0xf0] sm:$0xff] %v2250_v57 }
 0x366   : > { %2860 = shalt.err (!%p2857_p5)
}
 0x367   : > { %s2861_s8 = scalar_lea.hbm %s4425_s30, 4096  ;;  %s2865_s10 = scalar_lea.hbm %s4486_s4, 8192 }
 0x368   : > { %p2862_p6 = scmp.ne.s32.totalorder %s4425_s30, %s2861_s8  ;;  %p2866_p10 = scmp.lt.u32.totalorder %s4425_s30, %s4486_s4 }
 0x369   : > { %p2867_p11 = scmp.lt.u32.totalorder %s2865_s10, %s2861_s8  ;;  %p2869_p13 = scmp.lt.u32.totalorder %s2861_s8, %s4425_s30 }
 0x36a   : > { %p2863_p7 = pnand %p2862_p6, %p3002_p4 }
 0x36b   : > { %p2868_p12 = por %p2867_p11, %p2866_p10 }
 0x36c   : > { %p2864_p9 = pneg %p2863_p7 }
 0x36d   : > { %p2870_p0 = por %p2869_p13, %p2868_p12 }
 0x36f   : > { %p2871_p1 = pnand %p2870_p0, %p2864_p9 }
 0x371   : > { %2874 = shalt.err (!%p2871_p1)
}
 0x372   : > { %s2936_s14 = smov 128  }
 0x373   : > { %2783 = dma.vmem_to_hbm [thread:$0]  (%p3002_p4), %s4428_s21, 4096, %s4425_s30, %s4435_s18, %s2936_s14, %s2936_s14, %s2928_s12  }
 0x374 PF: > { %p2789_p2 = scmp.ge.s32.totalorder %s2925_s20, 2  ;;  %s2324_s22 = sand.u32 1, %s2905_s15  }
 0x375   : > { %s2325_s26 = scalar_lea.sflag [#allocation4], %s2324_s22 }
 0x376   : > { %p2786_p3 = pnand %p2789_p2, %p3009_p8 }
 0x378   : > { %2900 = dma.done.wait (!%p2786_p3), %s2325_s26, 4096  }
 0x379   : > { %2902 = vsyncadd (!%p2786_p3), %s2325_s26, 4294963200  ;;  %s17_s20 = sadd.s32 1, %s2925_s20   ;;  %s4621_s15 = smov %s2909_s16 }
 0x37a   : > { %p14_p5 = scmp.ge.s32.totalorder %s17_s20, 4   ;;  %s4622_s16 = smov %s2913_s17 }
 0x37b   : > { %s4623_s17 = smov %s3015_s28  ;;  %s4624_s18 = smov %s2921_s19 }
 0x37c   : > { %s4625_s19 = smov %s4627_s23  ;;  %16 = sbr.rel (!%p14_p5) target bundleno = 4 (0x4), region = 87 }
 0x383   :  { %2330 = vsyncpa [#allocation4], 1 }
 0x384   :  { %2332 = vsyncpa [#allocation4 + $0x1], 1 }

</bundles_post_ra>
